<compile_context>
chip_gen: v5e
topology: v5e:2x2
jax: 0.10.0
libtpu: 0.0.40
codegen_flags: <defaults>
</compile_context>

<pallas_src>
import functools

import jax
import jax.numpy as jnp
from jax.experimental import pallas as pl
from jax.experimental.pallas import tpu as pltpu


def _round_up(n: int, m: int) -> int:
    return -(-n // m) * m


def _lsr_ce_kernel(x_ref, y_ref, out_ref, acc_ref, *,
                   eps: float, n_classes: int, chunk_rows: int, n_chunks: int):
    # x_ref: (ROWS, C) native dtype; y_ref: (ROWS, 1) int32 (-1 == invalid row);
    # out_ref: (1, 8, 128) f32 per-tile partial; acc_ref: (chunk_rows, 1) f32 scratch.
    acc_ref[...] = jnp.zeros_like(acc_ref)

    on_w = 1.0 - eps + eps / n_classes     # weight at c == y
    off_w = eps / n_classes                # weight at c != y

    def chunk(j, carry):
        r0 = pl.multiple_of(j * chunk_rows, chunk_rows)
        xc = x_ref[pl.ds(r0, chunk_rows), :]            # native dtype (CR, C)
        yc = y_ref[pl.ds(r0, chunk_rows), :]            # int32 (CR, 1)

        # Row-wise max in native dtype (exact), rest of the math in f32 on
        # chunk-sized values only (no full-tile f32 slab).
        m = jnp.max(xc, axis=1, keepdims=True).astype(jnp.float32)       # (CR, 1)
        xf = xc.astype(jnp.float32)                                      # (CR, C)
        sum_e = jnp.sum(jnp.exp(xf - m), axis=1, keepdims=True)          # (CR, 1)
        lse = m + jnp.log(sum_e)                                         # (CR, 1)

        # Fused smoothed-target weighted sum (single traversal):
        #   wx = sum_c (eps/C + (1-eps)*[c==y]) * x_c
        cls = jax.lax.broadcasted_iota(jnp.int32, (chunk_rows, n_classes), 1)
        tv = jnp.where(cls == yc, on_w, off_w)                           # (CR, C)
        wx = jnp.sum(xf * tv, axis=1, keepdims=True)                     # (CR, 1)

        per_row = lse - wx                                               # (CR, 1)
        # Select (not multiply): invalid rows (y == -1, incl. the ragged tail of
        # the last block whose logits are undefined) contribute exactly 0 even
        # if per_row is NaN/Inf there.
        acc_ref[...] += jnp.where(yc >= 0, per_row, 0.0)
        return carry

    jax.lax.fori_loop(0, n_chunks, chunk, 0)

    # Lane-dense per-tile partial sum; no serialized cross-step accumulator.
    out_ref[...] = jnp.full(out_ref.shape, jnp.sum(acc_ref[...]), dtype=jnp.float32)


def _vmem_capacity_bytes() -> int:
    try:
        cap = int(pltpu.get_tpu_info().vmem_capacity_bytes)
        if cap > 0:
            return cap
    except Exception:
        pass
    return 64 * 1024 * 1024     # conservative fallback (v7x per-TC capacity)


def lsr_cross_entropy(x, y, lens, eps: float = 0.1):
    """x: (B, T, C) float (any dtype), y: (B, T) int, lens: (B,) int -> scalar f32."""
    B, T, C = x.shape
    N = B * T
    itemsize = int(jnp.dtype(x.dtype).itemsize)

    x2 = x.reshape(N, C)                       # native dtype, NOT padded
    lens = lens.astype(jnp.int32)
    valid_bt = jnp.arange(T, dtype=jnp.int32)[None, :] < lens[:, None]    # (B, T)
    y2 = jnp.where(valid_bt, y.astype(jnp.int32), -1).reshape(N)          # -1 sentinel

    # --- tiling ---------------------------------------------------------------
    sub = max(8, 32 // max(itemsize, 1))       # 8 rows/sublane-group f32, 16 bf16

    # In-kernel chunk: bounds f32 intermediates to ~3 MiB (a few CR x C f32 temps).
    cr = (3 * 1024 * 1024) // max(16 * C, 1)
    chunk_rows = max(sub, min(256, (cr // sub) * sub))

    vmem_cap = _vmem_capacity_bytes()
    budget = max(8 << 20, int(0.40 * vmem_cap))            # working-set target
    fixed = 4 * chunk_rows * C * 4 + chunk_rows * 512 + (2 << 20)   # temps + acc + headroom
    per_row_bytes = 2 * C * itemsize + 2 * 128 * 4          # x dbl-buf + lane-padded y blocks
    avail = max(budget - fixed, 0)
    rows = min(max(avail // per_row_bytes, chunk_rows), 8192, _round_up(N, chunk_rows))
    rows = max(chunk_rows, (rows // chunk_rows) * chunk_rows)

    num_tiles = -(-N // rows)
    # Keep >= 2 tiles where possible so the parallel grid axis maps onto both
    # v7x TensorCores.
    if num_tiles == 1 and rows > chunk_rows:
        half = _round_up(-(-N // 2), chunk_rows)
        if half < rows:
            rows = half
            num_tiles = -(-N // rows)

    n_chunks = rows // chunk_rows
    n_pad = num_tiles * rows

    # Only the tiny y array is padded (with the invalid sentinel).
    if n_pad > N:
        y2 = jnp.pad(y2, (0, n_pad - N), constant_values=-1)
    y_col = y2.reshape(n_pad, 1)

    vmem_limit = max(32 * 1024 * 1024, int(0.75 * vmem_cap))

    kernel = functools.partial(_lsr_ce_kernel, eps=float(eps), n_classes=C,
                               chunk_rows=chunk_rows, n_chunks=n_chunks)

    partials = pl.pallas_call(
        kernel,
        out_shape=jax.ShapeDtypeStruct((num_tiles, 8, 128), jnp.float32),
        grid_spec=pltpu.PrefetchScalarGridSpec(
            num_scalar_prefetch=0,
            grid=(num_tiles,),
            in_specs=[
                pl.BlockSpec((rows, C), lambda i: (i, 0)),     # ragged last block OK
                pl.BlockSpec((rows, 1), lambda i: (i, 0)),
            ],
            out_specs=pl.BlockSpec((1, 8, 128), lambda i: (i, 0, 0)),
            scratch_shapes=[pltpu.VMEM((chunk_rows, 1), jnp.float32)],
        ),
        compiler_params=pltpu.CompilerParams(
            dimension_semantics=("parallel",),
            vmem_limit_bytes=vmem_limit),
    )(x2, y_col)

    # pack_padded_sequence requires lens >= 1, so sum(lens) > 0 in practice;
    # maximum() only guards the degenerate all-zero case.
    total_pos = jnp.maximum(jnp.sum(lens).astype(jnp.float32), 1.0)
    return jnp.sum(partials[:, 0, 0]) / total_pos


def _reference(x, y, lens, eps=0.1):
    # Pure-JAX reference for validation.
    B, T, C = x.shape
    logp = jax.nn.log_softmax(x.astype(jnp.float32), axis=-1)
    onehot = jax.nn.one_hot(y, C, dtype=jnp.float32)
    tv = onehot * (1.0 - eps) + eps / C
    per_pos = -jnp.sum(tv * logp, axis=-1)                     # (B, T)
    mask = (jnp.arange(T)[None, :] < lens[:, None]).astype(jnp.float32)
    return jnp.sum(per_pos * mask) / jnp.sum(lens).astype(jnp.float32)


if __name__ == "__main__":
    key = jax.random.PRNGKey(0)
    kx, ky, kl = jax.random.split(key, 3)

    # Small but large enough (N = 280 rows) to exercise 2 grid tiles and the
    # ragged (unpadded) last block.
    B, T, C = 4, 70, 32
    x = jax.random.normal(kx, (B, T, C), dtype=jnp.float32)
    y = jax.random.randint(ky, (B, T), 0, C, dtype=jnp.int32)
    lens = jax.random.randint(kl, (B,), 1, T + 1, dtype=jnp.int32)

    # f32 inputs: strict check against the reference.
    loss = lsr_cross_entropy(x, y, lens, eps=0.1)
    jax.block_until_ready(loss)
    ref = _reference(x, y, lens, eps=0.1)
    assert jnp.allclose(loss, ref, rtol=1e-5, atol=1e-5), (loss, ref)

    # bf16 inputs: exercises the native-dtype (half-bandwidth) DMA path and
    # the 16-row sublane alignment.
    x_bf16 = x.astype(jnp.bfloat16)
    loss_bf16 = lsr_cross_entropy(x_bf16, y, lens, eps=0.1)
    jax.block_until_ready(loss_bf16)
    ref_bf16 = _reference(x_bf16, y, lens, eps=0.1)
    assert jnp.allclose(loss_bf16, ref_bf16, rtol=1e-3, atol=1e-3), (loss_bf16, ref_bf16)

    print("KERNEL_OK")
</pallas_src>

<mosaic_0001>
module attributes {stable_mosaic.version = 11 : i64} {
  func.func @_lsr_ce_kernel(%arg0: i32, %arg1: memref<256x32xf32, #tpu.memory_space<vmem>>, %arg2: memref<256x1xi32, #tpu.memory_space<vmem>>, %arg3: memref<1x8x128xf32, #tpu.memory_space<vmem>>, %arg4: memref<256x1xf32, #tpu.memory_space<vmem>>) attributes {dimension_semantics = [#tpu.dimension_semantics<parallel>], iteration_bounds = array<i64: 2>, scalar_prefetch = 0 : i64, scratch_operands = 1 : i64, tpu.core_type = #tpu.core_type<tc>, window_params = [{transform_indices = @transform_0, window_bounds = array<i64: 256, 32>}, {transform_indices = @transform_1, window_bounds = array<i64: 256, 1>}, {transform_indices = @transform_2, window_bounds = array<i64: 1, 8, 128>}]} {
    %cst = arith.constant 0.000000e+00 : f32
    %0 = vector.broadcast %cst : f32 to vector<256x1xf32>
    %c0 = arith.constant 0 : index
    %c0_0 = arith.constant 0 : index
    %1 = vector.load %arg4[%c0, %c0_0] : memref<256x1xf32, #tpu.memory_space<vmem>>, vector<256x1xf32>
    tpu.vector_store %arg4[%c0, %c0_0], %0 {strides = array<i32>} : memref<256x1xf32, #tpu.memory_space<vmem>>, vector<256x1xf32>,
    %c0_i32 = arith.constant 0 : i32
    %c256_i32 = arith.constant 256 : i32
    %2 = arith.muli %c0_i32, %c256_i32 : i32
    %3 = tpu.assume_multiple %2, 256 : i32
    %4 = arith.index_cast %3 : i32 to index
    %c0_1 = arith.constant 0 : index
    %5 = vector.load %arg1[%4, %c0_1] : memref<256x32xf32, #tpu.memory_space<vmem>>, vector<256x32xf32>
    %6 = arith.index_cast %3 : i32 to index
    %c0_2 = arith.constant 0 : index
    %7 = vector.load %arg2[%6, %c0_2] : memref<256x1xi32, #tpu.memory_space<vmem>>, vector<256x1xi32>
    %cst_3 = arith.constant dense<0xFF800000> : vector<256xf32>
    %8 = vector.multi_reduction <maximumf>, %5, %cst_3 [1] : vector<256x32xf32> to vector<256xf32>
    %9 = vector.shape_cast %8 : vector<256xf32> to vector<256x1xf32>
    %10 = vector.broadcast %9 : vector<256x1xf32> to vector<256x32xf32>
    %11 = arith.subf %5, %10 : vector<256x32xf32>
    %12 = math.exp %11 : vector<256x32xf32>
    %cst_4 = arith.constant dense<0.000000e+00> : vector<256xf32>
    %13 = vector.multi_reduction <add>, %12, %cst_4 [1] : vector<256x32xf32> to vector<256xf32>
    %14 = vector.shape_cast %13 : vector<256xf32> to vector<256x1xf32>
    %15 = math.log %14 : vector<256x1xf32>
    %16 = arith.addf %9, %15 : vector<256x1xf32>
    %17 = tpu.iota {dimensions = array<i32: 1>} : vector<256x32xi32>
    %18 = vector.broadcast %7 : vector<256x1xi32> to vector<256x32xi32>
    %19 = arith.cmpi eq, %17, %18 : vector<256x32xi32>
    %cst_5 = arith.constant 0.903124988 : f32
    %cst_6 = arith.constant 3.125000e-03 : f32
    %20 = vector.broadcast %cst_5 : f32 to vector<256x32xf32>
    %21 = vector.broadcast %cst_6 : f32 to vector<256x32xf32>
    %22 = arith.select %19, %20, %21 : vector<256x32xi1>, vector<256x32xf32>
    %23 = arith.mulf %5, %22 : vector<256x32xf32>
    %cst_7 = arith.constant dense<0.000000e+00> : vector<256xf32>
    %24 = vector.multi_reduction <add>, %23, %cst_7 [1] : vector<256x32xf32> to vector<256xf32>
    %25 = vector.shape_cast %24 : vector<256xf32> to vector<256x1xf32>
    %26 = arith.subf %16, %25 : vector<256x1xf32>
    %c0_8 = arith.constant 0 : index
    %c0_9 = arith.constant 0 : index
    %27 = vector.load %arg4[%c0_8, %c0_9] : memref<256x1xf32, #tpu.memory_space<vmem>>, vector<256x1xf32>
    %c0_i32_10 = arith.constant 0 : i32
    %28 = vector.broadcast %c0_i32_10 : i32 to vector<256x1xi32>
    %29 = arith.cmpi sge, %7, %28 : vector<256x1xi32>
    %cst_11 = arith.constant 0.000000e+00 : f32
    %30 = vector.broadcast %cst_11 : f32 to vector<256x1xf32>
    %31 = arith.select %29, %26, %30 : vector<256x1xi1>, vector<256x1xf32>
    %32 = arith.addf %27, %31 : vector<256x1xf32>
    %c0_12 = arith.constant 0 : index
    %c0_13 = arith.constant 0 : index
    %33 = vector.load %arg4[%c0_12, %c0_13] : memref<256x1xf32, #tpu.memory_space<vmem>>, vector<256x1xf32>
    tpu.vector_store %arg4[%c0_12, %c0_13], %32 {strides = array<i32>} : memref<256x1xf32, #tpu.memory_space<vmem>>, vector<256x1xf32>,
    %c1_i32 = arith.constant 1 : i32
    %c0_14 = arith.constant 0 : index
    %c0_15 = arith.constant 0 : index
    %34 = vector.load %arg4[%c0_14, %c0_15] : memref<256x1xf32, #tpu.memory_space<vmem>>, vector<256x1xf32>
    %35 = vector.shape_cast %34 : vector<256x1xf32> to vector<1x256x1xf32>
    %cst_16 = arith.constant dense<0.000000e+00> : vector<1xf32>
    %36 = vector.multi_reduction <add>, %35, %cst_16 [1, 2] : vector<1x256x1xf32> to vector<1xf32>
    %37 = vector.shape_cast %36 : vector<1xf32> to vector<1x1x1xf32>
    %38 = vector.extract %37[0, 0, 0] : f32 from vector<1x1x1xf32>
    %39 = vector.broadcast %38 : f32 to vector<1x8x128xf32>
    %c0_17 = arith.constant 0 : index
    %c0_18 = arith.constant 0 : index
    %c0_19 = arith.constant 0 : index
    %40 = vector.load %arg3[%c0_17, %c0_18, %c0_19] : memref<1x8x128xf32, #tpu.memory_space<vmem>>, vector<1x8x128xf32>
    tpu.vector_store %arg3[%c0_17, %c0_18, %c0_19], %39 {strides = array<i32>} : memref<1x8x128xf32, #tpu.memory_space<vmem>>, vector<1x8x128xf32>,
    return
  }
  func.func @transform_0(%arg0: i32) -> (i32, i32) {
    %c0_i32 = arith.constant 0 : i32
    %c0_i32_0 = arith.constant 0 : i32
    return %arg0, %c0_i32 : i32, i32
  }
  func.func @transform_1(%arg0: i32) -> (i32, i32) {
    %c0_i32 = arith.constant 0 : i32
    %c0_i32_0 = arith.constant 0 : i32
    return %arg0, %c0_i32 : i32, i32
  }
  func.func @transform_2(%arg0: i32) -> (i32, i32, i32) {
    %c0_i32 = arith.constant 0 : i32
    %c0_i32_0 = arith.constant 0 : i32
    %c0_i32_1 = arith.constant 0 : i32
    return %arg0, %c0_i32, %c0_i32_0 : i32, i32, i32
  }
}

</mosaic_0001>

<bundles_post_ra>
// kernel: tpu_custom_call.1
= control target key start
LH: loop header
LB: loop body
LE: loop exit
PB: predicated region body
PF: predicated region fallthrough
CT: control target
= control target key end

     0   :  { %7 = vsyncpa [#allocation4], 0  ;;  %s2600_s0 = inlined_call_operand.vmem [shape: f32[280,32], index: 0, kind: input, shape index: {}]   ;;  %s2601_s1 = inlined_call_operand.vmem [shape: s32[512,1], index: 1, kind: input, shape index: {}]   ;;  %s2602_s2 = inlined_call_operand.hbm [shape: f32[2,8,128], index: 2, kind: output, shape index: {}]  }
   0x1   :  { %9 = vsyncpa [#allocation4 + $0x1], 0  ;;  %s1644_s9 = smov 0   ;;  %s1646_s10 = smov 0  }
   0x2   :  { %s1648_s11 = smov 0   ;;  %s1650_s12 = smov 0  }
   0x3 LB: > { %s1665_s13 = sadd.s32 4294967295, %s1624_s12   ;;  %s1343_s14 = sadd.s32 4294967294, %s1624_s12   ;;  %s1624_s12 = sphi %s1650_s12, %s2696_s12   ;;  %s1620_s11 = sphi %s1648_s11, %s2695_s11   ;;  %s1616_s10 = sphi %s1646_s10, %s2694_s10   ;;  %s1612_s9 = sphi %s1644_s9, %s2693_s9  }
   0x4   : > { %s1669_s15 = sadd.s32 1, %s1624_s12   ;;  %s74_s16 = sadd.s32 1, %s1620_s11 }
   0x5   : > { %s71_s17 = ssub.s32 %s1624_s12, %s1669_s15  ;;  %p84_p0 = scmp.ne.s32.totalorder %s1620_s11, %s1616_s10 }
   0x6   : > { %p72_p1 = scmp.eq.s32.totalorder %s71_s17, 0  ;;  %p85_p2 = scmp.eq.s32.totalorder %s1665_s13, 1 }
   0x7   : > { %p90_p3 = scmp.ne.s32.totalorder %s1616_s10, %s1612_s9  ;;  %p91_p4 = scmp.eq.s32.totalorder %s1343_s14, 1 }
   0x8   : > { %s1680_s18 = scalar_select %p72_p1, %s1620_s11, %s74_s16  }
   0x9   : > { %p1682_p5 = por %p85_p2, %p84_p0  ;;  %p1686_p6 = por %p91_p4, %p90_p3 }
   0xa   : > { %p1346_p7 = scmp.ge.s32.totalorder %s1624_s12, 1  ;;  %p135_p8 = scmp.lt.s32.totalorder %s1624_s12, 3 }
   0xc   : > { %p136_p9 = pnand %p1346_p7, %p135_p8 }
   0xe   : > { %139 = sbr.rel (%p136_p9) target bundleno = 1065 (0x429), region = 28 }
  0x13   : > { %s1693_s21 = sshll.u32 %s1665_s13, 5  ;;  %vm283_vm0 = vcmask 261120   ;;  %vm186_vm7 = vcmask 7168   ;;  %s163_s3 = sand.u32 1, %s1616_s10  }
  0x14   : > { %p171_p10 = scmp.lt.s32.totalorder %s1693_s21, 34  ;;  %p181_p11 = scmp.lt.s32.totalorder %s1693_s21, 63 }
  0x15   : > { %s1347_s4 = sshll.u32 %s163_s3, 3  ;;  %s1353_s5 = sshll.u32 %s1665_s13, 3 }
  0x16   : > { %s172_s22 = scalar_select %p171_p10, %s1693_s21, 34 }
  0x17   : > { %s2698_s21 = smov (!%p181_p11, %s1693_s21), 63  ;;  %s1267_s8 = scalar_lea.hbm %s2602_s2, %s1353_s5 }
  0x18   : > { %s1349_s23 = sshll.u32 %s172_s22, 3  ;;  %s1351_s27 = sshll.u32 %s2698_s21, 3 }
  0x19   : > { %s1700_s26 = scalar_lea.vmem %s2600_s0, %s1349_s23  ;;  %s2027_s30 = scalar_lea.vmem %s2601_s1, %s1351_s27 }
  0x1a   : > { %v1703_v0 = vld [vmem:[%s1700_s26 + $0x20] sm:$0xff]  ;;  %v1706_v1 = vld [vmem:[%s1700_s26 + $0x10] sm:$0xff]  ;;  %v1718_v6 = vld [vmem:[%s1700_s26 + $0x28] sm:$0xff]  ;;  %s165_s14 = scalar_lea.vmem [#allocation3], %s1347_s4  ;;  %s1271_s17 = sshll.u32 %s1267_s8, 4  ;;  %s1272_s17 = int_to_ptr.hbm [resolvable:$true] %s1271_s17 }
  0x1b   : > { %v1709_v2 = vld [vmem:[%s1700_s26] sm:$0xff]  ;;  %v296_v3 = vsel %vm283_vm0, %v1703_v0, -inf  ;;  %v290_v4 = vsel %vm283_vm0, %v1706_v1, -inf  ;;  %v1721_v7 = vld [vmem:[%s1700_s26 + $0x18] sm:$0xff]  ;;  %v1724_v8 = vld [vmem:[%s1700_s26 + $0x8] sm:$0xff]  ;;  %v299_v9 = vsel %vm283_vm0, %v1718_v6, -inf }
  0x1c   : > { %v284_v5 = vsel %vm283_vm0, %v1709_v2, -inf  ;;  %297 = vmax.xlane.f32.xlu2 %v296_v3  ;;  %291 = vmax.xlane.f32.xlu1 %v290_v4  ;;  %v293_v10 = vsel %vm283_vm0, %v1721_v7, -inf  ;;  %v287_v11 = vsel %vm283_vm0, %v1724_v8, -inf  ;;  %v1733_v12 = vld [vmem:[%s1700_s26 + $0x40] sm:$0xff]  ;;  %v1736_v13 = vld [vmem:[%s1700_s26 + $0x38] sm:$0xff]  ;;  %v1739_v14 = vld [vmem:[%s1700_s26 + $0x30] sm:$0xff] }
  0x1d   : > { %285 = vmax.xlane.f32.xlu0 %v284_v5  ;;  %v308_v15 = vsel %vm283_vm0, %v1733_v12, -inf  ;;  %v305_v16 = vsel %vm283_vm0, %v1736_v13, -inf  ;;  %v302_v17 = vsel %vm283_vm0, %v1739_v14, -inf  ;;  %v1748_v18 = vld [vmem:[%s1700_s26 + $0x58] sm:$0xff]  ;;  %v1751_v19 = vld [vmem:[%s1700_s26 + $0x50] sm:$0xff]  ;;  %v1754_v20 = vld [vmem:[%s1700_s26 + $0x48] sm:$0xff] }
  0x1e   : > { %v317_v21 = vsel %vm283_vm0, %v1748_v18, -inf  ;;  %v314_v22 = vsel %vm283_vm0, %v1751_v19, -inf  ;;  %v311_v23 = vsel %vm283_vm0, %v1754_v20, -inf  ;;  %v1763_v24 = vld [vmem:[%s1700_s26 + $0x70] sm:$0xff]  ;;  %v1766_v25 = vld [vmem:[%s1700_s26 + $0x68] sm:$0xff]  ;;  %v1769_v26 = vld [vmem:[%s1700_s26 + $0x60] sm:$0xff] }
  0x1f   : > { %v326_v27 = vsel %vm283_vm0, %v1763_v24, -inf  ;;  %v323_v28 = vsel %vm283_vm0, %v1766_v25, -inf  ;;  %v320_v29 = vsel %vm283_vm0, %v1769_v26, -inf  ;;  %v1778_v30 = vld [vmem:[%s1700_s26 + $0x88] sm:$0xff]  ;;  %v1781_v31 = vld [vmem:[%s1700_s26 + $0x80] sm:$0xff]  ;;  %v1784_v32 = vld [vmem:[%s1700_s26 + $0x78] sm:$0xff] }
  0x20   : > { %v335_v33 = vsel %vm283_vm0, %v1778_v30, -inf  ;;  %v332_v34 = vsel %vm283_vm0, %v1781_v31, -inf  ;;  %v329_v35 = vsel %vm283_vm0, %v1784_v32, -inf  ;;  %v1793_v36 = vld [vmem:[%s1700_s26 + $0xa0] sm:$0xff]  ;;  %v1796_v37 = vld [vmem:[%s1700_s26 + $0x98] sm:$0xff]  ;;  %v1799_v38 = vld [vmem:[%s1700_s26 + $0x90] sm:$0xff] }
  0x21   : > { %v344_v39 = vsel %vm283_vm0, %v1793_v36, -inf  ;;  %v341_v40 = vsel %vm283_vm0, %v1796_v37, -inf  ;;  %v338_v41 = vsel %vm283_vm0, %v1799_v38, -inf  ;;  %v1808_v42 = vld [vmem:[%s1700_s26 + $0xb8] sm:$0xff]  ;;  %v1811_v43 = vld [vmem:[%s1700_s26 + $0xb0] sm:$0xff]  ;;  %v1814_v44 = vld [vmem:[%s1700_s26 + $0xa8] sm:$0xff] }
  0x22   : > { %v353_v45 = vsel %vm283_vm0, %v1808_v42, -inf  ;;  %v350_v46 = vsel %vm283_vm0, %v1811_v43, -inf  ;;  %v347_v47 = vsel %vm283_vm0, %v1814_v44, -inf  ;;  %v1823_v48 = vld [vmem:[%s1700_s26 + $0xd0] sm:$0xff]  ;;  %v1826_v49 = vld [vmem:[%s1700_s26 + $0xc8] sm:$0xff]  ;;  %v1829_v50 = vld [vmem:[%s1700_s26 + $0xc0] sm:$0xff] }
  0x23   : > { %v362_v51 = vsel %vm283_vm0, %v1823_v48, -inf  ;;  %v359_v52 = vsel %vm283_vm0, %v1826_v49, -inf  ;;  %v356_v53 = vsel %vm283_vm0, %v1829_v50, -inf  ;;  %v1838_v54 = vld [vmem:[%s1700_s26 + $0xe8] sm:$0xff]  ;;  %v1841_v55 = vld [vmem:[%s1700_s26 + $0xe0] sm:$0xff]  ;;  %v1844_v56 = vld [vmem:[%s1700_s26 + $0xd8] sm:$0xff] }
  0x24   : > { %300 = vmax.xlane.f32.xlu2 %v299_v9  ;;  %294 = vmax.xlane.f32.xlu1 %v293_v10  ;;  %v371_v57 = vsel %vm283_vm0, %v1838_v54, -inf  ;;  %v368_v58 = vsel %vm283_vm0, %v1841_v55, -inf  ;;  %v365_v59 = vsel %vm283_vm0, %v1844_v56, -inf  ;;  %v1853_v60 = vld [vmem:[%s1700_s26 + $0xf8] sm:$0xff]  ;;  %v1856_v61 = vld [vmem:[%s1700_s26 + $0xf0] sm:$0xff]  ;;  %s1269_s16 = sshll.u32 %s165_s14, 4  ;;  %s1270_s16 = int_to_ptr.vmem [resolvable:$true] %s1269_s16 }
  0x25   : > { %288 = vmax.xlane.f32.xlu0 %v287_v11  ;;  %v377_v62 = vsel %vm283_vm0, %v1853_v60, -inf  ;;  %v374_v63 = vsel %vm283_vm0, %v1856_v61, -inf  ;;  %s1257_s22 = scalar_lea.sflag [#allocation4], %s163_s3  ;;  %s1576_s23 = sshra.s32 %s1272_s17, 4  ;;  %s1577_s23 = int_to_ptr.hbm [resolvable:$true] %s1576_s23 }
  0x26   : > { %s1578_s24 = scalar_lea.hbm %s1577_s23, 8  ;;  %p1583_p1 = scmp.lt.s32.totalorder %s1577_s23, %s2602_s2 }
  0x27   : > { %p1579_p12 = scmp.ne.s32.totalorder %s1577_s23, %s1578_s24 }
  0x29   : > { %p1580_p13 = pnand %p1579_p12, %p1682_p5 }
  0x2b   : > { %p1581_p0 = pneg %p1580_p13 }
  0x2c   : > { %309 = vmax.xlane.f32.xlu2 %v308_v15  ;;  %306 = vmax.xlane.f32.xlu1 %v305_v16 }
  0x2d   : > { %303 = vmax.xlane.f32.xlu0 %v302_v17 }
  0x34   : > { %318 = vmax.xlane.f32.xlu2 %v317_v21  ;;  %315 = vmax.xlane.f32.xlu1 %v314_v22 }
  0x35   : > { %312 = vmax.xlane.f32.xlu0 %v311_v23 }
  0x3c   : > { %327 = vmax.xlane.f32.xlu2 %v326_v27  ;;  %324 = vmax.xlane.f32.xlu1 %v323_v28 }
  0x3d   : > { %321 = vmax.xlane.f32.xlu0 %v320_v29 }
  0x44   : > { %336 = vmax.xlane.f32.xlu2 %v335_v33  ;;  %333 = vmax.xlane.f32.xlu1 %v332_v34 }
  0x45   : > { %330 = vmax.xlane.f32.xlu0 %v329_v35 }
  0x4c   : > { %345 = vmax.xlane.f32.xlu2 %v344_v39  ;;  %342 = vmax.xlane.f32.xlu1 %v341_v40 }
  0x4d   : > { %339 = vmax.xlane.f32.xlu0 %v338_v41 }
  0x54   : > { %354 = vmax.xlane.f32.xlu2 %v353_v45  ;;  %351 = vmax.xlane.f32.xlu1 %v350_v46 }
  0x55   : > { %348 = vmax.xlane.f32.xlu0 %v347_v47 }
  0x5c   : > { %363 = vmax.xlane.f32.xlu2 %v362_v51  ;;  %360 = vmax.xlane.f32.xlu1 %v359_v52 }
  0x5d   : > { %357 = vmax.xlane.f32.xlu0 %v356_v53 }
  0x64   : > { %372 = vmax.xlane.f32.xlu2 %v371_v57  ;;  %369 = vmax.xlane.f32.xlu1 %v368_v58 }
  0x65   : > { %366 = vmax.xlane.f32.xlu0 %v365_v59 }
  0x6c   : > { %378 = vmax.xlane.f32.xlu1 %v377_v62 }
  0x6d   : > { %375 = vmax.xlane.f32.xlu0 %v374_v63 }
  0x8f   : > { %v1862_v3 = vpop.xlane.xlu2 %297  ;;  %v1864_v4 = vpop.xlane.xlu1 %291 }
  0x90   : > { %v382_v5 = vsub.f32 %v1706_v1, %v1864_v4  ;;  %v1868_v9 = vpop.xlane.xlu0 %285  ;;  %v384_v34 = vsub.f32 %v1703_v0, %v1862_v3 }
  0x91   : > { %v380_v10 = vsub.f32 %v1709_v2, %v1868_v9 }
  0x92   : > { %v416_v11 = vmul.f32 1.442695, %v382_v5  ;;  %v420_v45 = vmul.f32 1.442695, %v384_v34 }
  0x93   : > { %v412_v15 = vmul.f32 1.442695, %v380_v10 }
  0x94   : > { %1403 = vpow2.f32 %v416_v11 }
  0x95   : > { %1405 = vpow2.f32 %v412_v15 }
  0x97   : > { %v1872_v16 = vpop.xlane.xlu2 %300  ;;  %v1874_v17 = vpop.xlane.xlu1 %294 }
  0x98   : > { %v385_v21 = vsub.f32 %v1718_v6, %v1872_v16  ;;  %v383_v22 = vsub.f32 %v1721_v7, %v1874_v17  ;;  %v1880_v23 = vpop.xlane.xlu0 %288 }
  0x99   : > { %v381_v27 = vsub.f32 %v1724_v8, %v1880_v23 }
  0x9a   : > { %v422_v28 = vmul.f32 1.442695, %v385_v21  ;;  %v418_v29 = vmul.f32 1.442695, %v383_v22  ;;  %v1404_v33 = vpop.eup %1403 }
  0x9b   : > { %v414_v35 = vmul.f32 1.442695, %v381_v27  ;;  %v1406_v39 = vpop.eup %1405  ;;  %v482_v40 = vsel %vm283_vm0, %v1404_v33, 0.0 }
  0x9c   : > { %1407 = vpow2.f32 %v422_v28  ;;  %483 = vadd.xlane.f32.xlu1 %v482_v40  ;;  %v476_v41 = vsel %vm283_vm0, %v1406_v39, 0.0 }
  0x9d   : > { %1409 = vpow2.f32 %v418_v29  ;;  %477 = vadd.xlane.f32.xlu2 %v476_v41 }
  0x9e   : > { %1411 = vpow2.f32 %v414_v35 }
  0x9f   : > { %v1888_v46 = vpop.xlane.xlu2 %309  ;;  %v1890_v47 = vpop.xlane.xlu1 %306  ;;  %1413 = vpow2.f32 %v420_v45 }
  0xa0   : > { %v388_v51 = vsub.f32 %v1733_v12, %v1888_v46  ;;  %v1894_v52 = vpop.xlane.xlu0 %303  ;;  %v387_v59 = vsub.f32 %v1736_v13, %v1890_v47 }
  0xa1   : > { %v386_v53 = vsub.f32 %v1739_v14, %v1894_v52 }
  0xa2   : > { %v1408_v57 = vpop.eup %1407  ;;  %v428_v58 = vmul.f32 1.442695, %v388_v51  ;;  %v426_v14 = vmul.f32 1.442695, %v387_v59 }
  0xa3   : > { %v1410_v62 = vpop.eup %1409  ;;  %v424_v63 = vmul.f32 1.442695, %v386_v53  ;;  %v491_v5 = vsel %vm283_vm0, %v1408_v57, 0.0 }
  0xa4   : > { %v1412_v10 = vpop.eup %1411  ;;  %1415 = vpow2.f32 %v428_v58  ;;  %v485_v11 = vsel %vm283_vm0, %v1410_v62, 0.0  ;;  %492 = vadd.xlane.f32.xlu1 %v491_v5 }
  0xa5   : > { %1417 = vpow2.f32 %v424_v63  ;;  %v479_v12 = vsel %vm283_vm0, %v1412_v10, 0.0  ;;  %486 = vadd.xlane.f32.xlu2 %v485_v11  ;;  %v1414_v27 = vpop.eup %1413 }
  0xa6   : > { %480 = vadd.xlane.f32.xlu0 %v479_v12  ;;  %1419 = vpow2.f32 %v426_v14 }
  0xa7   : > { %v1903_v15 = vpop.xlane.xlu2 %318  ;;  %v1905_v21 = vpop.xlane.xlu1 %315 }
  0xa8   : > { %v391_v13 = vsub.f32 %v1748_v18, %v1903_v15  ;;  %v1909_v22 = vpop.xlane.xlu0 %312  ;;  %v390_v34 = vsub.f32 %v1751_v19, %v1905_v21  ;;  %v488_v18 = vsel %vm283_vm0, %v1414_v27, 0.0 }
  0xa9   : > { %v389_v28 = vsub.f32 %v1754_v20, %v1909_v22 }
  0xaa   : > { %v1416_v29 = vpop.eup %1415  ;;  %v434_v33 = vmul.f32 1.442695, %v391_v13  ;;  %v432_v20 = vmul.f32 1.442695, %v390_v34 }
  0xab   : > { %v1418_v35 = vpop.eup %1417  ;;  %v430_v39 = vmul.f32 1.442695, %v389_v28  ;;  %v500_v40 = vsel %vm283_vm0, %v1416_v29, 0.0 }
  0xac   : > { %1421 = vpow2.f32 %v434_v33  ;;  %v494_v41 = vsel %vm283_vm0, %v1418_v35, 0.0  ;;  %501 = vadd.xlane.f32.xlu1 %v500_v40  ;;  %v1420_v53 = vpop.eup %1419 }
  0xad   : > { %1423 = vpow2.f32 %v430_v39  ;;  %495 = vadd.xlane.f32.xlu2 %v494_v41  ;;  %v497_v12 = vsel %vm283_vm0, %v1420_v53, 0.0 }
  0xae   : > { %489 = vadd.xlane.f32.xlu0 %v488_v18  ;;  %1425 = vpow2.f32 %v432_v20 }
  0xaf   : > { %v1918_v45 = vpop.xlane.xlu2 %327  ;;  %v1920_v51 = vpop.xlane.xlu1 %324 }
  0xb0   : > { %v394_v19 = vsub.f32 %v1763_v24, %v1918_v45  ;;  %v1924_v57 = vpop.xlane.xlu0 %321  ;;  %v393_v63 = vsub.f32 %v1766_v25, %v1920_v51 }
  0xb1   : > { %v392_v58 = vsub.f32 %v1769_v26, %v1924_v57 }
  0xb2   : > { %v1422_v59 = vpop.eup %1421  ;;  %v440_v62 = vmul.f32 1.442695, %v394_v19  ;;  %v438_v26 = vmul.f32 1.442695, %v393_v63 }
  0xb3   : > { %v1424_v5 = vpop.eup %1423  ;;  %v436_v10 = vmul.f32 1.442695, %v392_v58  ;;  %v509_v11 = vsel %vm283_vm0, %v1422_v59, 0.0 }
  0xb4   : > { %1427 = vpow2.f32 %v440_v62  ;;  %v503_v24 = vsel %vm283_vm0, %v1424_v5, 0.0  ;;  %510 = vadd.xlane.f32.xlu1 %v509_v11  ;;  %v1426_v27 = vpop.eup %1425 }
  0xb5   : > { %1429 = vpow2.f32 %v436_v10  ;;  %504 = vadd.xlane.f32.xlu2 %v503_v24  ;;  %v506_v18 = vsel %vm283_vm0, %v1426_v27, 0.0 }
  0xb6   : > { %498 = vadd.xlane.f32.xlu0 %v497_v12  ;;  %1431 = vpow2.f32 %v438_v26 }
  0xb7   : > { %v1933_v14 = vpop.xlane.xlu2 %336  ;;  %v1935_v13 = vpop.xlane.xlu1 %333 }
  0xb8   : > { %2632 = vst [vmem:[#allocation6_spill] sm:$0xff] %v1933_v14  ;;  %v397_v25 = vsub.f32 %v1778_v30, %v1933_v14  ;;  %v1939_v28 = vpop.xlane.xlu0 %330  ;;  %v396_v35 = vsub.f32 %v1781_v31, %v1935_v13 }
  0xb9   : > { %v395_v29 = vsub.f32 %v1784_v32, %v1939_v28 }
  0xba   : > { %v1428_v33 = vpop.eup %1427  ;;  %v446_v34 = vmul.f32 1.442695, %v397_v25  ;;  %v444_v32 = vmul.f32 1.442695, %v396_v35 }
  0xbb   : > { %v1430_v39 = vpop.eup %1429  ;;  %v442_v40 = vmul.f32 1.442695, %v395_v29  ;;  %v518_v41 = vsel %vm283_vm0, %v1428_v33, 0.0 }
  0xbc   : > { %1433 = vpow2.f32 %v446_v34  ;;  %v512_v30 = vsel %vm283_vm0, %v1430_v39, 0.0  ;;  %519 = vadd.xlane.f32.xlu1 %v518_v41  ;;  %v1432_v19 = vpop.eup %1431 }
  0xbd   : > { %1435 = vpow2.f32 %v442_v40  ;;  %513 = vadd.xlane.f32.xlu2 %v512_v30  ;;  %v515_v24 = vsel %vm283_vm0, %v1432_v19, 0.0 }
  0xbe   : > { %507 = vadd.xlane.f32.xlu0 %v506_v18  ;;  %1437 = vpow2.f32 %v444_v32 }
  0xbf   : > { %v1948_v20 = vpop.xlane.xlu2 %345  ;;  %v1950_v53 = vpop.xlane.xlu1 %342 }
  0xc0   : > { %2633 = vst [vmem:[#allocation7_spill] sm:$0xff] %v1948_v20  ;;  %v400_v31 = vsub.f32 %v1793_v36, %v1948_v20  ;;  %v1954_v58 = vpop.xlane.xlu0 %339  ;;  %v399_v5 = vsub.f32 %v1796_v37, %v1950_v53 }
  0xc1   : > { %2634 = vst [vmem:[#allocation8_spill] sm:$0xff] %v1950_v53  ;;  %v398_v59 = vsub.f32 %v1799_v38, %v1954_v58 }
  0xc2   : > { %2635 = vst [vmem:[#allocation9_spill] sm:$0xff] %v1954_v58  ;;  %v1434_v62 = vpop.eup %1433  ;;  %v452_v63 = vmul.f32 1.442695, %v400_v31  ;;  %v450_v38 = vmul.f32 1.442695, %v399_v5 }
  0xc3   : > { %v1436_v10 = vpop.eup %1435  ;;  %v448_v11 = vmul.f32 1.442695, %v398_v59  ;;  %v527_v12 = vsel %vm283_vm0, %v1434_v62, 0.0 }
  0xc4   : > { %1439 = vpow2.f32 %v452_v63  ;;  %v521_v36 = vsel %vm283_vm0, %v1436_v10, 0.0  ;;  %528 = vadd.xlane.f32.xlu1 %v527_v12  ;;  %v1438_v25 = vpop.eup %1437 }
  0xc5   : > { %1441 = vpow2.f32 %v448_v11  ;;  %522 = vadd.xlane.f32.xlu2 %v521_v36  ;;  %v524_v30 = vsel %vm283_vm0, %v1438_v25, 0.0 }
  0xc6   : > { %516 = vadd.xlane.f32.xlu0 %v515_v24  ;;  %1443 = vpow2.f32 %v450_v38 }
  0xc7   : > { %v1963_v26 = vpop.xlane.xlu2 %354  ;;  %v1965_v27 = vpop.xlane.xlu1 %351 }
  0xc8   : > { %2636 = vst [vmem:[#allocation10_spill] sm:$0xff] %v1963_v26  ;;  %v403_v37 = vsub.f32 %v1808_v42, %v1963_v26  ;;  %v1969_v29 = vpop.xlane.xlu0 %348  ;;  %v402_v39 = vsub.f32 %v1811_v43, %v1965_v27 }
  0xc9   : > { %2637 = vst [vmem:[#allocation11_spill] sm:$0xff] %v1965_v27  ;;  %v401_v33 = vsub.f32 %v1814_v44, %v1969_v29  ;;  %v668_v27 = vlaneseq }
  0xca   : > { %2638 = vst [vmem:[#allocation12_spill] sm:$0xff] %v1969_v29  ;;  %v1440_v34 = vpop.eup %1439  ;;  %v458_v35 = vmul.f32 1.442695, %v403_v37  ;;  %v456_v44 = vmul.f32 1.442695, %v402_v39  ;;  %v1626_v37 = vmov 0  }
  0xcb   : > { %v1442_v40 = vpop.eup %1441  ;;  %v454_v41 = vmul.f32 1.442695, %v401_v33  ;;  %v536_v18 = vsel %vm283_vm0, %v1440_v34, 0.0  ;;  %1400 = vset.pattern.permute.xlu1 %v1626_v37  ;;  %1402 = vset.pattern.permute.xlu0 %v1626_v37  ;;  %v2111_v29 = vand.u32 127, %v668_v27 }
  0xcc   : > { %1445 = vpow2.f32 %v458_v35  ;;  %v530_v42 = vsel %vm283_vm0, %v1442_v40, 0.0  ;;  %537 = vadd.xlane.f32.xlu1 %v536_v18  ;;  %v1444_v31 = vpop.eup %1443  ;;  %1401 = vset.pattern.permute.xlu2 %v1626_v37 }
  0xcd   : > { %1447 = vpow2.f32 %v454_v41  ;;  %531 = vadd.xlane.f32.xlu2 %v530_v42  ;;  %v533_v36 = vsel %vm283_vm0, %v1444_v31, 0.0 }
  0xce   : > { %525 = vadd.xlane.f32.xlu0 %v524_v30  ;;  %1449 = vpow2.f32 %v456_v44 }
  0xcf   : > { %v1978_v32 = vpop.xlane.xlu2 %363  ;;  %v1980_v19 = vpop.xlane.xlu1 %360 }
  0xd0   : > { %2639 = vst [vmem:[#allocation13_spill] sm:$0xff] %v1978_v32  ;;  %v406_v43 = vsub.f32 %v1823_v48, %v1978_v32  ;;  %v1984_v59 = vpop.xlane.xlu0 %357  ;;  %v405_v10 = vsub.f32 %v1826_v49, %v1980_v19 }
  0xd1   : > { %2640 = vst [vmem:[#allocation14_spill] sm:$0xff] %v1980_v19  ;;  %v404_v62 = vsub.f32 %v1829_v50, %v1984_v59 }
  0xd2   : > { %2641 = vst [vmem:[#allocation15_spill] sm:$0xff] %v1984_v59  ;;  %v1446_v63 = vpop.eup %1445  ;;  %v464_v5 = vmul.f32 1.442695, %v406_v43  ;;  %v462_v50 = vmul.f32 1.442695, %v405_v10 }
  0xd3   : > { %v1448_v11 = vpop.eup %1447  ;;  %v460_v12 = vmul.f32 1.442695, %v404_v62  ;;  %v545_v24 = vsel %vm283_vm0, %v1446_v63, 0.0 }
  0xd4   : > { %1451 = vpow2.f32 %v464_v5  ;;  %v539_v48 = vsel %vm283_vm0, %v1448_v11, 0.0  ;;  %546 = vadd.xlane.f32.xlu1 %v545_v24  ;;  %v1450_v49 = vpop.eup %1449 }
  0xd5   : > { %1453 = vpow2.f32 %v460_v12  ;;  %540 = vadd.xlane.f32.xlu2 %v539_v48  ;;  %v542_v44 = vsel %vm283_vm0, %v1450_v49, 0.0 }
  0xd6   : > { %534 = vadd.xlane.f32.xlu0 %v533_v36  ;;  %1455 = vpow2.f32 %v462_v50 }
  0xd7   : > { %v1993_v38 = vpop.xlane.xlu2 %372  ;;  %v1995_v25 = vpop.xlane.xlu1 %369 }
  0xd8   : > { %2642 = vst [vmem:[#allocation16_spill] sm:$0xff] %v1993_v38  ;;  %v409_v33 = vsub.f32 %v1838_v54, %v1993_v38  ;;  %v1999_v34 = vpop.xlane.xlu0 %366  ;;  %v408_v41 = vsub.f32 %v1841_v55, %v1995_v25 }
  0xd9   : > { %2643 = vst [vmem:[#allocation17_spill] sm:$0xff] %v1995_v25  ;;  %v407_v35 = vsub.f32 %v1844_v56, %v1999_v34 }
  0xda   : > { %2644 = vst [vmem:[#allocation18_spill] sm:$0xff] %v1999_v34  ;;  %v1452_v39 = vpop.eup %1451  ;;  %v470_v40 = vmul.f32 1.442695, %v409_v33  ;;  %v468_v56 = vmul.f32 1.442695, %v408_v41  ;;  %v2042_v41 = vld [vmem:[%s2027_s30 + $0x10] sm:$0xff] }
  0xdb   : > { %v1454_v18 = vpop.eup %1453  ;;  %v466_v30 = vmul.f32 1.442695, %v407_v35  ;;  %v554_v42 = vsel %vm283_vm0, %v1452_v39, 0.0  ;;  %v2030_v35 = vld [vmem:[%s2027_s30] sm:$0xff]  ;;  %vm1024_vm12 = vcmp.ge.s32.totalorder %v2042_v41, 0 }
  0xdc   : > { %1457 = vpow2.f32 %v470_v40  ;;  %v548_v54 = vsel %vm283_vm0, %v1454_v18, 0.0  ;;  %555 = vadd.xlane.f32.xlu1 %v554_v42  ;;  %v1456_v43 = vpop.eup %1455  ;;  %v2034_v39 = vld [vmem:[%s2027_s30 + $0x20] sm:$0xff]  ;;  %v2037_v40 = vld [vmem:[%s2027_s30 + $0x8] sm:$0xff]  ;;  %v2046_v18 = vld [vmem:[%s2027_s30 + $0x18] sm:$0xff]  ;;  %vm1022_vm9 = vcmp.ge.s32.totalorder %v2030_v35, 0 }
  0xdd   : > { %1459 = vpow2.f32 %v466_v30  ;;  %549 = vadd.xlane.f32.xlu2 %v548_v54  ;;  %v551_v24 = vsel %vm283_vm0, %v1456_v43, 0.0  ;;  %vm1023_vm8 = vcmp.ge.s32.totalorder %v2037_v40, 0  ;;  %vm1025_vm10 = vcmp.ge.s32.totalorder %v2046_v18, 0 }
  0xde   : > { %543 = vadd.xlane.f32.xlu0 %v542_v44  ;;  %1461 = vpow2.f32 %v468_v56  ;;  %v2054_v44 = vld [vmem:[%s2027_s30 + $0x28] sm:$0xff]  ;;  %vm1026_vm13 = vcmp.ge.s32.totalorder %v2034_v39, 0 }
  0xdf   : > { %v2008_v31 = vpop.xlane.xlu1 %378  ;;  %vm1027_vm11 = vcmp.ge.s32.totalorder %v2054_v44, 0 }
  0xe0   : > { %2645 = vst [vmem:[#allocation19_spill] sm:$0xff] %v2008_v31  ;;  %v2010_v62 = vpop.xlane.xlu0 %375  ;;  %v411_v5 = vsub.f32 %v1853_v60, %v2008_v31 }
  0xe1   : > { %2646 = vst [vmem:[#allocation20_spill] sm:$0xff] %v2010_v62  ;;  %v410_v55 = vsub.f32 %v1856_v61, %v2010_v62 }
  0xe2   : > { %v1458_v63 = vpop.eup %1457  ;;  %v474_v61 = vmul.f32 1.442695, %v411_v5 }
  0xe3   : > { %v1460_v10 = vpop.eup %1459  ;;  %v472_v11 = vmul.f32 1.442695, %v410_v55  ;;  %v563_v12 = vsel %vm283_vm0, %v1458_v63, 0.0 }
  0xe4   : > { %v557_v36 = vsel %vm283_vm0, %v1460_v10, 0.0  ;;  %564 = vadd.xlane.f32.xlu1 %v563_v12  ;;  %v1462_v48 = vpop.eup %1461 }
  0xe5   : > { %1463 = vpow2.f32 %v472_v11  ;;  %558 = vadd.xlane.f32.xlu2 %v557_v36  ;;  %v560_v60 = vsel %vm283_vm0, %v1462_v48, 0.0 }
  0xe6   : > { %552 = vadd.xlane.f32.xlu0 %v551_v24  ;;  %1465 = vpow2.f32 %v474_v61 }
  0xeb   : > { %v1464_v50 = vpop.eup %1463 }
  0xec   : > { %v566_v37 = vsel %vm283_vm0, %v1464_v50, 0.0  ;;  %v1466_v49 = vpop.eup %1465 }
  0xed   : > { %567 = vadd.xlane.f32.xlu2 %v566_v37  ;;  %v569_v33 = vsel %vm283_vm0, %v1466_v49, 0.0 }
  0xee   : > { %561 = vadd.xlane.f32.xlu0 %v560_v60 }
  0xf6   : > { %570 = vadd.xlane.f32.xlu0 %v569_v33 }
  0xfd   : > { %671 = vperm.xlu1 %1400, %v2030_v35  }
 0x105   : > { %683 = vperm.xlu1 %1400, %v2034_v39   ;;  %674 = vperm.xlu2 %1401, %v2037_v40  }
 0x10a   : > { %677 = vperm.xlu0 %1402, %v2042_v41  }
 0x10d   : > { %680 = vperm.xlu2 %1401, %v2046_v18  }
 0x10f   : > { %v2049_v30 = vpop.xlane.xlu1 %483 }
 0x110   : > { %v2051_v42 = vpop.xlane.xlu2 %477 }
 0x115   : > { %686 = vperm.xlu2 %1401, %v2054_v44  }
 0x117   : > { %v2057_v54 = vpop.xlane.xlu1 %492 }
 0x118   : > { %v2059_v56 = vpop.xlane.xlu2 %486 }
 0x119   : > { %v2061_v43 = vpop.xlane.xlu0 %480 }
 0x11a   : > { %1467 = vlog2.f32 %v2061_v43 }
 0x11b   : > { %1469 = vlog2.f32 %v2051_v42 }
 0x11c   : > { %1471 = vlog2.f32 %v2059_v56 }
 0x11d   : > { %1473 = vlog2.f32 %v2057_v54 }
 0x11e   : > { %1475 = vlog2.f32 %v2049_v30 }
 0x11f   : > { %v2067_v5 = vpop.xlane.xlu1 %501 }
 0x120   : > { %v2063_v55 = vpop.xlane.xlu2 %495 }
 0x121   : > { %v2065_v63 = vpop.xlane.xlu0 %489 }
 0x122   : > { %1477 = vlog2.f32 %v2065_v63 }
 0x127   : > { %v2073_v12 = vpop.xlane.xlu1 %510 }
 0x128   : > { %v2069_v10 = vpop.xlane.xlu2 %504 }
 0x129   : > { %v2071_v11 = vpop.xlane.xlu0 %498 }
 0x12a   : > { %1479 = vlog2.f32 %v2071_v11 }
 0x12b   : > { %1481 = vlog2.f32 %v2063_v55 }
 0x12f   : > { %v2079_v61 = vpop.xlane.xlu1 %519 }
 0x130   : > { %v2075_v24 = vpop.xlane.xlu2 %513 }
 0x131   : > { %v2077_v36 = vpop.xlane.xlu0 %507 }
 0x132   : > { %1483 = vlog2.f32 %v2077_v36 }
 0x133   : > { %1485 = vlog2.f32 %v2067_v5 }
 0x134   : > { %1487 = vlog2.f32 %v2073_v12 }
 0x137   : > { %v2085_v60 = vpop.xlane.xlu1 %528 }
 0x138   : > { %v2081_v48 = vpop.xlane.xlu2 %522 }
 0x139   : > { %v2083_v50 = vpop.xlane.xlu0 %516 }
 0x13a   : > { %1489 = vlog2.f32 %v2083_v50 }
 0x13b   : > { %1491 = vlog2.f32 %v2079_v61 }
 0x13c   : > { %1493 = vlog2.f32 %v2069_v10 }
 0x13d   : > { %1495 = vlog2.f32 %v2075_v24 }
 0x13f   : > { %v2093_v31 = vpop.xlane.xlu1 %537 }
 0x140   : > { %v2087_v37 = vpop.xlane.xlu2 %531 }
 0x141   : > { %v2089_v49 = vpop.xlane.xlu0 %525 }
 0x142   : > { %1497 = vlog2.f32 %v2089_v49 }
 0x147   : > { %v2099_v38 = vpop.xlane.xlu1 %546 }
 0x148   : > { %v2091_v33 = vpop.xlane.xlu2 %540  ;;  %2648 = vst [vmem:[#allocation22_spill] sm:$0xff] %v2099_v38 }
 0x149   : > { %v2095_v62 = vpop.xlane.xlu0 %534 }
 0x14f   : > { %v2105_v19 = vpop.xlane.xlu1 %555 }
 0x150   : > { %v2097_v25 = vpop.xlane.xlu2 %549  ;;  %2651 = vst [vmem:[#allocation25_spill] sm:$0xff] %v2105_v19 }
 0x151   : > { %2647 = vst [vmem:[#allocation21_spill] sm:$0xff] %v2097_v25  ;;  %v2101_v34 = vpop.xlane.xlu0 %543  ;;  %v2617_v25 = vmov 0.003125  }
 0x152   : > { %2649 = vst [vmem:[#allocation23_spill] sm:$0xff] %v2101_v34 }
 0x157   : > { %v2113_v20 = vpop.xlane.xlu1 %564 }
 0x158   : > { %v2103_v32 = vpop.xlane.xlu2 %558  ;;  %2654 = vst [vmem:[#allocation28_spill] sm:$0xff] %v2113_v20 }
 0x159   : > { %2650 = vst [vmem:[#allocation24_spill] sm:$0xff] %v2103_v32  ;;  %v2107_v59 = vpop.xlane.xlu0 %552 }
 0x15a   : > { %2652 = vst [vmem:[#allocation26_spill] sm:$0xff] %v2107_v59 }
 0x160   : > { %v2109_v26 = vpop.xlane.xlu2 %567 }
 0x161   : > { %2653 = vst [vmem:[#allocation27_spill] sm:$0xff] %v2109_v26  ;;  %v2115_v58 = vpop.xlane.xlu0 %561 }
 0x162   : > { %2655 = vst [vmem:[#allocation29_spill] sm:$0xff] %v2115_v58 }
 0x168   : > { %v675_v53 = vpop.permute.xlu2 %674 }
 0x169   : > { %vm767_vm1 = vcmp.eq.s32.totalorder %v2111_v29, %v675_v53  ;;  %v2125_v20 = vpop.xlane.xlu0 %570 }
 0x16a   : > { %v799_v34 = vsel %vm767_vm1, 0.903125, %v2617_v25  ;;  %2656 = vst [vmem:[#allocation30_spill] sm:$0xff] %v2125_v20 }
 0x16b   : > { %v831_v32 = vmul.f32 %v799_v34, %v1724_v8 }
 0x16d   : > { %v865_v19 = vsel %vm283_vm0, %v831_v32, 0.0 }
 0x16e   : > { %866 = vadd.xlane.f32.xlu2 %v865_v19 }
 0x16f   : > { %v672_v59 = vpop.permute.xlu1 %671 }
 0x170   : > { %vm766_vm2 = vcmp.eq.s32.totalorder %v2111_v29, %v672_v59  ;;  %v681_v27 = vpop.permute.xlu2 %680 }
 0x171   : > { %v798_v26 = vsel %vm766_vm2, 0.903125, %v2617_v25  ;;  %vm769_vm3 = vcmp.eq.s32.totalorder %v2111_v29, %v681_v27 }
 0x172   : > { %v830_v58 = vmul.f32 %v798_v26, %v1709_v2  ;;  %v801_v53 = vsel %vm769_vm3, 0.903125, %v2617_v25 }
 0x173   : > { %v833_v8 = vmul.f32 %v801_v53, %v1721_v7 }
 0x174   : > { %v862_v38 = vsel %vm283_vm0, %v830_v58, 0.0 }
 0x175   : > { %863 = vadd.xlane.f32.xlu0 %v862_v38  ;;  %v871_v59 = vsel %vm283_vm0, %v833_v8, 0.0 }
 0x177   : > { %v684_v34 = vpop.permute.xlu1 %683 }
 0x178   : > { %v687_v32 = vpop.permute.xlu2 %686  ;;  %vm770_vm6 = vcmp.eq.s32.totalorder %v2111_v29, %v684_v34  ;;  %v2164_v34 = vld [vmem:[%s2027_s30 + $0x80] sm:$0xff] }
 0x179   : > { %vm771_vm4 = vcmp.eq.s32.totalorder %v2111_v29, %v687_v32  ;;  %v2144_v32 = vld [vmem:[%s2027_s30 + $0x38] sm:$0xff] }
 0x17a   : > { %v803_v19 = vsel %vm771_vm4, 0.903125, %v2617_v25 }
 0x17b   : > { %v835_v2 = vmul.f32 %v803_v19, %v1718_v6  ;;  %v802_v6 = vsel %vm770_vm6, 0.903125, %v2617_v25  ;;  %v2148_v19 = vld [vmem:[%s2027_s30 + $0x50] sm:$0xff]  ;;  %vm1029_vm6 = vcmp.ge.s32.totalorder %v2144_v32, 0 }
 0x17c   : > { %v678_v27 = vpop.permute.xlu0 %677  ;;  %v834_v53 = vmul.f32 %v802_v6, %v1703_v0  ;;  %v2160_v0 = vld [vmem:[%s2027_s30 + $0x40] sm:$0xff]  ;;  %v276_v6 = vld [vmem:[%s2027_s30 + $0xc8] sm:$0xff] }
 0x17d   : > { %vm768_vm5 = vcmp.eq.s32.totalorder %v2111_v29, %v678_v27  ;;  %872 = vadd.xlane.f32.xlu0 %v871_v59  ;;  %v877_v7 = vsel %vm283_vm0, %v835_v2, 0.0  ;;  %v2156_v59 = vld [vmem:[%s2027_s30 + $0x68] sm:$0xff]  ;;  %v2168_v27 = vld [vmem:[%s2027_s30 + $0x58] sm:$0xff] }
 0x17e   : > { %v800_v58 = vsel %vm768_vm5, 0.903125, %v2617_v25  ;;  %878 = vadd.xlane.f32.xlu2 %v877_v7  ;;  %v874_v8 = vsel %vm283_vm0, %v834_v53, 0.0  ;;  %v2172_v2 = vld [vmem:[%s2027_s30 + $0x98] sm:$0xff]  ;;  %v273_v7 = vld [vmem:[%s2027_s30 + $0xb0] sm:$0xff]  ;;  %v2198_v53 = vld [vmem:[%s2027_s30 + $0xa0] sm:$0xff] }
 0x17f   : > { %v832_v26 = vmul.f32 %v800_v58, %v1706_v1  ;;  %v2152_v1 = vld [vmem:[%s2027_s30 + $0x30] sm:$0xff]  ;;  %2657 = vst [vmem:[#allocation31_spill] sm:$0xff] %v2172_v2  ;;  %v278_v25 = vld [vmem:[%s2027_s30 + $0xd8] sm:$0xff] }
 0x180   : > { %v2176_v58 = vld [vmem:[%s2027_s30 + $0x70] sm:$0xff]  ;;  %2659 = vst [vmem:[#allocation33_spill] sm:$0xff] %v2198_v53 }
 0x181   : > { %v868_v38 = vsel %vm283_vm0, %v832_v26, 0.0  ;;  %v1628_v26 = vmov 0.0  }
 0x182   : > { %869 = vadd.xlane.f32.xlu1 %v868_v38  ;;  %188 = vst.msk [vmem:[#allocation2 + $0x8] sm:$0xff] %vm186_vm7, %v1628_v26  ;;  %v2185_v38 = vld [vmem:[%s2027_s30 + $0x88] sm:$0xff] }
 0x183   : > { %187 = vst.msk [vmem:[#allocation2] sm:$0xff] %vm186_vm7, %v1628_v26 }
 0x184   : > { %189 = vst.msk [vmem:[#allocation2 + $0x10] sm:$0xff] %vm186_vm7, %v1628_v26 }
 0x185   : > { %190 = vst.msk [vmem:[#allocation2 + $0x18] sm:$0xff] %vm186_vm7, %v1628_v26 }
 0x186   : > { %2658 = vst [vmem:[#allocation32_spill] sm:$0xff] %v2185_v38 }
 0x187   : > { %191 = vst.msk [vmem:[#allocation2 + $0x20] sm:$0xff] %vm186_vm7, %v1628_v26 }
 0x188   : > { %192 = vst.msk [vmem:[#allocation2 + $0x28] sm:$0xff] %vm186_vm7, %v1628_v26 }
 0x189   : > { %193 = vst.msk [vmem:[#allocation2 + $0x30] sm:$0xff] %vm186_vm7, %v1628_v26 }
 0x18a   : > { %875 = vadd.xlane.f32.xlu1 %v874_v8  ;;  %194 = vst.msk [vmem:[#allocation2 + $0x38] sm:$0xff] %vm186_vm7, %v1628_v26  ;;  %v281_v8 = vld [vmem:[%s2027_s30 + $0xf0] sm:$0xff] }
 0x18b   : > { %195 = vst.msk [vmem:[#allocation2 + $0x40] sm:$0xff] %vm186_vm7, %v1628_v26 }
 0x18c   : > { %196 = vst.msk [vmem:[#allocation2 + $0x48] sm:$0xff] %vm186_vm7, %v1628_v26 }
 0x18d   : > { %197 = vst.msk [vmem:[#allocation2 + $0x50] sm:$0xff] %vm186_vm7, %v1628_v26 }
 0x18e   : > { %198 = vst.msk [vmem:[#allocation2 + $0x58] sm:$0xff] %vm186_vm7, %v1628_v26 }
 0x18f   : > { %199 = vst.msk [vmem:[#allocation2 + $0x60] sm:$0xff] %vm186_vm7, %v1628_v26 }
 0x190   : > { %200 = vst.msk [vmem:[#allocation2 + $0x68] sm:$0xff] %vm186_vm7, %v1628_v26  ;;  %v996_v36 = vld [vmem:[#allocation2 + $0x30] sm:$0xff] }
 0x191   : > { %201 = vst.msk [vmem:[#allocation2 + $0x70] sm:$0xff] %vm186_vm7, %v1628_v26 }
 0x192   : > { %202 = vst.msk [vmem:[#allocation2 + $0x78] sm:$0xff] %vm186_vm7, %v1628_v26  ;;  %v998_v12 = vld [vmem:[#allocation2 + $0x40] sm:$0xff] }
 0x193   : > { %203 = vst.msk [vmem:[#allocation2 + $0x80] sm:$0xff] %vm186_vm7, %v1628_v26  ;;  %v999_v49 = vld [vmem:[#allocation2 + $0x48] sm:$0xff] }
 0x194   : > { %204 = vst.msk [vmem:[#allocation2 + $0x88] sm:$0xff] %vm186_vm7, %v1628_v26 }
 0x195   : > { %205 = vst.msk [vmem:[#allocation2 + $0x90] sm:$0xff] %vm186_vm7, %v1628_v26 }
 0x196   : > { %692 = vperm.xlu2 %1401, %v2144_v32   ;;  %206 = vst.msk [vmem:[#allocation2 + $0x98] sm:$0xff] %vm186_vm7, %v1628_v26 }
 0x197   : > { %207 = vst.msk [vmem:[#allocation2 + $0xa0] sm:$0xff] %vm186_vm7, %v1628_v26 }
 0x198   : > { %208 = vst.msk [vmem:[#allocation2 + $0xa8] sm:$0xff] %vm186_vm7, %v1628_v26 }
 0x199   : > { %209 = vst.msk [vmem:[#allocation2 + $0xb0] sm:$0xff] %vm186_vm7, %v1628_v26 }
 0x19a   : > { %210 = vst.msk [vmem:[#allocation2 + $0xb8] sm:$0xff] %vm186_vm7, %v1628_v26 }
 0x19b   : > { %211 = vst.msk [vmem:[#allocation2 + $0xc0] sm:$0xff] %vm186_vm7, %v1628_v26 }
 0x19c   : > { %212 = vst.msk [vmem:[#allocation2 + $0xc8] sm:$0xff] %vm186_vm7, %v1628_v26 }
 0x19d   : > { %213 = vst.msk [vmem:[#allocation2 + $0xd0] sm:$0xff] %vm186_vm7, %v1628_v26 }
 0x19e   : > { %701 = vperm.xlu2 %1401, %v2148_v19   ;;  %214 = vst.msk [vmem:[#allocation2 + $0xd8] sm:$0xff] %vm186_vm7, %v1628_v26 }
 0x19f   : > { %215 = vst.msk [vmem:[#allocation2 + $0xe0] sm:$0xff] %vm186_vm7, %v1628_v26 }
 0x1a0   : > { %216 = vst.msk [vmem:[#allocation2 + $0xe8] sm:$0xff] %vm186_vm7, %v1628_v26 }
 0x1a1   : > { %217 = vst.msk [vmem:[#allocation2 + $0xf0] sm:$0xff] %vm186_vm7, %v1628_v26 }
 0x1a2   : > { %218 = vst.msk [vmem:[#allocation2 + $0xf8] sm:$0xff] %vm186_vm7, %v1628_v26 }
 0x1a3   : > { %689 = vperm.xlu1 %1400, %v2152_v1  }
 0x1a6   : > { %710 = vperm.xlu2 %1401, %v2156_v59  }
 0x1ab   : > { %695 = vperm.xlu1 %1400, %v2160_v0  }
 0x1ae   : > { %719 = vperm.xlu2 %1401, %v2164_v34  }
 0x1b3   : > { %704 = vperm.xlu1 %1400, %v2168_v27  }
 0x1b6   : > { %728 = vperm.xlu2 %1401, %v2172_v2   ;;  %v991_v2 = vld [vmem:[#allocation2 + $0x8] sm:$0xff] }
 0x1bb   : > { %713 = vperm.xlu1 %1400, %v2176_v58  }
 0x1be   : > { %737 = vperm.xlu2 %1401, %v273_v7   ;;  %v2211_v7 = vld [vmem:[%s2027_s30 + $0xb8] sm:$0xff] }
 0x1bf   : > { %2660 = vst [vmem:[#allocation34_spill] sm:$0xff] %v2211_v7 }
 0x1c3   : > { %722 = vperm.xlu1 %1400, %v2185_v38  }
 0x1c6   : > { %746 = vperm.xlu2 %1401, %v276_v6   ;;  %v2224_v6 = vld [vmem:[%s2027_s30 + $0xc0] sm:$0xff] }
 0x1c7   : > { %2661 = vst [vmem:[#allocation35_spill] sm:$0xff] %v2224_v6 }
 0x1cb   : > { %731 = vperm.xlu1 %1400, %v2198_v53  }
 0x1ce   : > { %761 = vperm.xlu2 %1401, %v281_v8   ;;  %v1468_v8 = vpop.eup %1467  ;;  %1499 = vlog2.f32 %v2081_v48 }
 0x1cf   : > { %v575_v43 = vmul.f32 0.6931472, %v1468_v8  ;;  %v1470_v20 = vpop.eup %1469  ;;  %1501 = vlog2.f32 %v2085_v60 }
 0x1d0   : > { %v573_v14 = vmul.f32 0.6931472, %v1470_v20  ;;  %v1472_v8 = vpop.eup %1471  ;;  %1503 = vlog2.f32 %v2087_v37 }
 0x1d1   : > { %v1474_v56 = vpop.eup %1473  ;;  %v579_v20 = vmul.f32 0.6931472, %v1472_v8  ;;  %1505 = vlog2.f32 %v2093_v31 }
 0x1d2   : > { %v636_v26 = vadd.f32 %v573_v14, %v1868_v9  ;;  %v1476_v54 = vpop.eup %1475  ;;  %1507 = vlog2.f32 %v2091_v33  ;;  %v2663_v33 = vld [vmem:[#allocation6_spill] sm:$0xff] }
 0x1d3   : > { %740 = vperm.xlu1 %1400, %v2211_v7   ;;  %v637_v7 = vadd.f32 %v575_v43, %v1880_v23  ;;  %v280_v23 = vld [vmem:[%s2027_s30 + $0xe8] sm:$0xff]  ;;  %v990_v43 = vld [vmem:[#allocation2] sm:$0xff]  ;;  %v577_v30 = vmul.f32 0.6931472, %v1476_v54  ;;  %v639_v9 = vadd.f32 %v579_v20, %v1874_v17 }
 0x1d4   : > { %v994_v54 = vld [vmem:[#allocation2 + $0x20] sm:$0xff] }
 0x1d5   : > { %v638_v63 = vadd.f32 %v577_v30, %v1864_v4 }
 0x1db   : > { %743 = vperm.xlu1 %1400, %v2224_v6  }
 0x1e1   : > { %v867_v53 = vpop.xlane.xlu2 %866 }
 0x1e2   : > { %v959_v38 = vsub.f32 %v637_v7, %v867_v53 }
 0x1e3   : > { %752 = vperm.xlu1 %1400, %v278_v25  }
 0x1e4   : > { %v1055_v42 = vsel %vm1023_vm8, %v959_v38, 0.0  ;;  %v583_v38 = vmul.f32 0.6931472, %v1474_v56  ;;  %vm1028_vm8 = vcmp.ge.s32.totalorder %v2152_v1, 0 }
 0x1e5   : > { %v1087_v6 = vadd.f32 %v1055_v42, %v991_v2 }
 0x1e6   : > { %v641_v14 = vadd.f32 %v583_v38, %v1872_v16 }
 0x1e7   : > { %1119 = vst.msk [vmem:[#allocation2 + $0x8] sm:$0xff] %vm186_vm7, %v1087_v6  ;;  %v993_v6 = vld [vmem:[#allocation2 + $0x18] sm:$0xff] }
 0x1e8   : > { %v864_v40 = vpop.xlane.xlu0 %863 }
 0x1e9   : > { %v958_v53 = vsub.f32 %v636_v26, %v864_v40  ;;  %v995_v26 = vld [vmem:[#allocation2 + $0x28] sm:$0xff]  ;;  %v1478_v40 = vpop.eup %1477  ;;  %1509 = vlog2.f32 %v2095_v62 }
 0x1ea   : > { %v581_v44 = vmul.f32 0.6931472, %v1478_v40  ;;  %v1533_v40 = vld [vmem:[%s1700_s26 + $0x50] sm:$0xff] }
 0x1eb   : > { %758 = vperm.xlu1 %1400, %v280_v23   ;;  %v1054_v25 = vsel %vm1022_vm9, %v958_v53, 0.0  ;;  %v992_v53 = vld [vmem:[#allocation2 + $0x10] sm:$0xff]  ;;  %vm1032_vm9 = vcmp.ge.s32.totalorder %v2148_v19, 0 }
 0x1ec   : > { %v1086_v2 = vadd.f32 %v1054_v25, %v990_v43  ;;  %v640_v4 = vadd.f32 %v581_v44, %v1862_v3 }
 0x1ee   : > { %1118 = vst.msk [vmem:[#allocation2] sm:$0xff] %vm186_vm7, %v1086_v2 }
 0x1f0   : > { %v873_v35 = vpop.xlane.xlu0 %872 }
 0x1f1   : > { %v879_v7 = vpop.xlane.xlu2 %878  ;;  %v961_v42 = vsub.f32 %v639_v9, %v873_v35 }
 0x1f2   : > { %v963_v23 = vsub.f32 %v641_v14, %v879_v7  ;;  %v2662_v14 = vmov 0.003125  }
 0x1f3   : > { %v1057_v8 = vsel %vm1025_vm10, %v961_v42, 0.0  ;;  %vm1030_vm10 = vcmp.ge.s32.totalorder %v2160_v0, 0 }
 0x1f4   : > { %v1059_v56 = vsel %vm1027_vm11, %v963_v23, 0.0  ;;  %v1089_v17 = vadd.f32 %v1057_v8, %v993_v6  ;;  %v1531_v6 = vld [vmem:[%s1700_s26 + $0x38] sm:$0xff]  ;;  %v1532_v8 = vld [vmem:[%s1700_s26 + $0x30] sm:$0xff]  ;;  %vm1033_vm11 = vcmp.ge.s32.totalorder %v2168_v27, 0 }
 0x1f5   : > { %v870_v43 = vpop.xlane.xlu1 %869  ;;  %v1091_v18 = vadd.f32 %v1059_v56, %v995_v26 }
 0x1f6   : > { %v960_v16 = vsub.f32 %v638_v63, %v870_v43  ;;  %1121 = vst.msk [vmem:[#allocation2 + $0x18] sm:$0xff] %vm186_vm7, %v1089_v17 }
 0x1f7   : > { %1123 = vst.msk [vmem:[#allocation2 + $0x28] sm:$0xff] %vm186_vm7, %v1091_v18 }
 0x1f8   : > { %v1056_v20 = vsel %vm1024_vm12, %v960_v16, 0.0  ;;  %v1534_v16 = vld [vmem:[%s1700_s26 + $0x40] sm:$0xff]  ;;  %vm1035_vm12 = vcmp.ge.s32.totalorder %v2156_v59, 0 }
 0x1f9   : > { %v1088_v25 = vadd.f32 %v1056_v20, %v992_v53  ;;  %v693_v9 = vpop.permute.xlu2 %692 }
 0x1fa   : > { %vm773_vm14 = vcmp.eq.s32.totalorder %v2111_v29, %v693_v9 }
 0x1fb   : > { %1120 = vst.msk [vmem:[#allocation2 + $0x10] sm:$0xff] %vm186_vm7, %v1088_v25  ;;  %v805_v35 = vsel %vm773_vm14, 0.903125, %v2662_v14 }
 0x1fc   : > { %v837_v42 = vmul.f32 %v1531_v6, %v805_v35  ;;  %v1536_v35 = vld [vmem:[%s1700_s26 + $0x68] sm:$0xff] }
 0x1fd   : > { %v876_v41 = vpop.xlane.xlu1 %875 }
 0x1fe   : > { %v962_v38 = vsub.f32 %v640_v4, %v876_v41  ;;  %v883_v3 = vsel %vm283_vm0, %v837_v42, 0.0  ;;  %v1155_v24 = vld [vmem:[#allocation2 + $0x28] sm:$0xff] }
 0x200   : > { %v1058_v2 = vsel %vm1026_vm13, %v962_v38, 0.0 }
 0x201   : > { %v1090_v30 = vadd.f32 %v1058_v2, %v994_v54  ;;  %v702_v7 = vpop.permute.xlu2 %701  ;;  %v1535_v54 = vld [vmem:[%s1700_s26 + $0x58] sm:$0xff] }
 0x202   : > { %vm776_vm15 = vcmp.eq.s32.totalorder %v2111_v29, %v702_v7 }
 0x203   : > { %1122 = vst.msk [vmem:[#allocation2 + $0x20] sm:$0xff] %vm186_vm7, %v1090_v30  ;;  %v808_v39 = vsel %vm776_vm15, 0.903125, %v2662_v14  ;;  %vm1036_vm15 = vcmp.ge.s32.totalorder %v2176_v58, 0  ;;  %v1540_v58 = vld [vmem:[%s1700_s26 + $0x60] sm:$0xff] }
 0x204   : > { %v840_v56 = vmul.f32 %v1533_v40, %v808_v39  ;;  %v1537_v39 = vld [vmem:[%s1700_s26 + $0x70] sm:$0xff] }
 0x205   : > { %v2297_v40 = vld [vmem:[%s2027_s30 + $0x90] sm:$0xff] }
 0x206   : > { %v892_v43 = vsel %vm283_vm0, %v840_v56, 0.0 }
 0x209   : > { %v711_v25 = vpop.permute.xlu2 %710 }
 0x20a   : > { %vm779_vm4 = vcmp.eq.s32.totalorder %v2111_v29, %v711_v25 }
 0x20b   : > { %v811_v30 = vsel %vm779_vm4, 0.903125, %v2662_v14 }
 0x20c   : > { %v843_v7 = vmul.f32 %v1536_v35, %v811_v30 }
 0x20e   : > { %v901_v6 = vsel %vm283_vm0, %v843_v7, 0.0  ;;  %v997_v7 = vld [vmem:[#allocation2 + $0x38] sm:$0xff] }
 0x215   : > { %884 = vadd.xlane.f32.xlu1 %v883_v3  ;;  %v690_v26 = vpop.permute.xlu1 %689  ;;  %v2283_v3 = vld [vmem:[%s2027_s30 + $0x48] sm:$0xff] }
 0x216   : > { %vm772_vm1 = vcmp.eq.s32.totalorder %v2111_v29, %v690_v26 }
 0x217   : > { %v804_v23 = vsel %vm772_vm1, 0.903125, %v2662_v14 }
 0x218   : > { %v836_v63 = vmul.f32 %v1532_v8, %v804_v23  ;;  %v2289_v8 = vld [vmem:[%s2027_s30 + $0x60] sm:$0xff] }
 0x21a   : > { %v880_v17 = vsel %vm283_vm0, %v836_v63, 0.0  ;;  %v2293_v63 = vld [vmem:[%s2027_s30 + $0x78] sm:$0xff] }
 0x21b   : > { %881 = vadd.xlane.f32.xlu0 %v880_v17  ;;  %v2303_v17 = vld [vmem:[%s2027_s30 + $0xa8] sm:$0xff] }
 0x21d   : > { %893 = vadd.xlane.f32.xlu1 %v892_v43  ;;  %v696_v18 = vpop.permute.xlu1 %695 }
 0x21e   : > { %vm774_vm2 = vcmp.eq.s32.totalorder %v2111_v29, %v696_v18  ;;  %v2309_v18 = vld [vmem:[%s2027_s30 + $0xd0] sm:$0xff] }
 0x21f   : > { %v806_v53 = vsel %vm774_vm2, 0.903125, %v2662_v14 }
 0x220   : > { %v838_v44 = vmul.f32 %v1534_v16, %v806_v53  ;;  %v2315_v16 = vld [vmem:[%s2027_s30 + $0xe0] sm:$0xff] }
 0x222   : > { %v886_v20 = vsel %vm283_vm0, %v838_v44, 0.0 }
 0x223   : > { %887 = vadd.xlane.f32.xlu0 %v886_v20  ;;  %v2321_v20 = vld [vmem:[%s2027_s30 + $0xf8] sm:$0xff] }
 0x225   : > { %v705_v4 = vpop.permute.xlu1 %704 }
 0x226   : > { %vm777_vm3 = vcmp.eq.s32.totalorder %v2111_v29, %v705_v4  ;;  %v1480_v4 = vpop.eup %1479 }
 0x227   : > { %v809_v41 = vsel %vm777_vm3, 0.903125, %v2662_v14 }
 0x228   : > { %v841_v38 = vmul.f32 %v1535_v54, %v809_v41  ;;  %v587_v54 = vmul.f32 0.6931472, %v1480_v4 }
 0x22a   : > { %v895_v2 = vsel %vm283_vm0, %v841_v38, 0.0  ;;  %v1482_v38 = vpop.eup %1481 }
 0x22b   : > { %896 = vadd.xlane.f32.xlu1 %v895_v2  ;;  %v643_v2 = vadd.f32 %v587_v54, %v1890_v47  ;;  %v1484_v30 = vpop.eup %1483  ;;  %v585_v35 = vmul.f32 0.6931472, %v1482_v38  ;;  %v1000_v38 = vld [vmem:[#allocation2 + $0x50] sm:$0xff] }
 0x22d   : > { %v714_v9 = vpop.permute.xlu1 %713 }
 0x22e   : > { %vm780_vm5 = vcmp.eq.s32.totalorder %v2111_v29, %v714_v9 }
 0x22f   : > { %v812_v42 = vsel %vm780_vm5, 0.903125, %v2662_v14 }
 0x230   : > { %v844_v26 = vmul.f32 %v1537_v39, %v812_v42  ;;  %v642_v39 = vadd.f32 %v585_v35, %v1894_v52 }
 0x232   : > { %v904_v23 = vsel %vm283_vm0, %v844_v26, 0.0  ;;  %v1486_v26 = vpop.eup %1485 }
 0x233   : > { %902 = vadd.xlane.f32.xlu1 %v901_v6  ;;  %v593_v6 = vmul.f32 0.6931472, %v1484_v30  ;;  %v589_v4 = vmul.f32 0.6931472, %v1486_v26  ;;  %v1488_v35 = vpop.eup %1487 }
 0x235   : > { %v2299_v56 = vpop.permute.xlu1 %722  ;;  %v646_v5 = vadd.f32 %v593_v6, %v1905_v21 }
 0x236   : > { %vm783_vm3 = vcmp.eq.s32.totalorder %v2111_v29, %v2299_v56  ;;  %v1543_v56 = vld [vmem:[%s1700_s26 + $0x90] sm:$0xff] }
 0x237   : > { %698 = vperm.xlu0 %1402, %v2283_v3  }
 0x23b   : > { %905 = vadd.xlane.f32.xlu1 %v904_v23 }
 0x23d   : > { %v2306_v43 = vpop.permute.xlu1 %731 }
 0x23f   : > { %707 = vperm.xlu0 %1402, %v2289_v8  }
 0x245   : > { %v2312_v53 = vpop.permute.xlu1 %740 }
 0x247   : > { %716 = vperm.xlu0 %1402, %v2293_v63  }
 0x24d   : > { %v2318_v44 = vpop.permute.xlu1 %743 }
 0x24f   : > { %725 = vperm.xlu0 %1402, %v2297_v40  }
 0x255   : > { %v2324_v25 = vpop.permute.xlu1 %752 }
 0x257   : > { %734 = vperm.xlu0 %1402, %v2303_v17  }
 0x25d   : > { %v2328_v41 = vpop.permute.xlu1 %758 }
 0x25f   : > { %749 = vperm.xlu0 %1402, %v2309_v18  }
 0x267   : > { %755 = vperm.xlu0 %1402, %v2315_v16  }
 0x26f   : > { %764 = vperm.xlu0 %1402, %v2321_v20  }
 0x288   : > { %v885_v9 = vpop.xlane.xlu1 %884 }
 0x289   : > { %v965_v11 = vsub.f32 %v643_v2, %v885_v9  ;;  %v644_v9 = vadd.f32 %v589_v4, %v1888_v46  ;;  %v720_v4 = vpop.permute.xlu2 %719 }
 0x28a   : > { %vm782_vm14 = vcmp.eq.s32.totalorder %v2111_v29, %v720_v4 }
 0x28b   : > { %v1061_v42 = vsel %vm1029_vm6, %v965_v11, 0.0  ;;  %vm786_vm6 = vcmp.eq.s32.totalorder %v2111_v29, %v2306_v43  ;;  %v1545_v43 = vld [vmem:[%s1700_s26 + $0xa0] sm:$0xff] }
 0x28c   : > { %v1093_v55 = vadd.f32 %v1061_v42, %v997_v7  ;;  %v595_v7 = vmul.f32 0.6931472, %v1488_v35  ;;  %v1004_v35 = vld [vmem:[#allocation2 + $0x70] sm:$0xff] }
 0x28e   : > { %1125 = vst.msk [vmem:[#allocation2 + $0x38] sm:$0xff] %vm186_vm7, %v1093_v55  ;;  %v882_v47 = vpop.xlane.xlu0 %881  ;;  %v647_v42 = vadd.f32 %v595_v7, %v1903_v15  ;;  %v1490_v55 = vpop.eup %1489 }
 0x28f   : > { %v964_v23 = vsub.f32 %v642_v39, %v882_v47  ;;  %v1001_v39 = vld [vmem:[#allocation2 + $0x58] sm:$0xff]  ;;  %v599_v26 = vmul.f32 0.6931472, %v1490_v55 }
 0x290   : > { %v894_v32 = vpop.xlane.xlu1 %893 }
 0x291   : > { %v1060_v54 = vsel %vm1028_vm8, %v964_v23, 0.0  ;;  %v968_v2 = vsub.f32 %v646_v5, %v894_v32  ;;  %v649_v50 = vadd.f32 %v599_v26, %v1920_v51  ;;  %v1492_v23 = vpop.eup %1491  ;;  %v1003_v5 = vld [vmem:[#allocation2 + $0x68] sm:$0xff]  ;;  %v729_v26 = vpop.permute.xlu2 %728 }
 0x292   : > { %v1092_v52 = vadd.f32 %v1060_v54, %v996_v36  ;;  %v601_v27 = vmul.f32 0.6931472, %v1492_v23  ;;  %v1538_v51 = vld [vmem:[%s1700_s26 + $0x48] sm:$0xff]  ;;  %v815_v23 = vsel %vm783_vm3, 0.903125, %v2662_v14  ;;  %vm785_vm5 = vcmp.eq.s32.totalorder %v2111_v29, %v729_v26 }
 0x293   : > { %v1064_v30 = vsel %vm1032_vm9, %v968_v2, 0.0 }
 0x294   : > { %1124 = vst.msk [vmem:[#allocation2 + $0x30] sm:$0xff] %vm186_vm7, %v1092_v52  ;;  %v1096_v1 = vadd.f32 %v1064_v30, %v1000_v38  ;;  %v650_v59 = vadd.f32 %v601_v27, %v1918_v45 }
 0x296   : > { %1128 = vst.msk [vmem:[#allocation2 + $0x50] sm:$0xff] %vm186_vm7, %v1096_v1  ;;  %v888_v21 = vpop.xlane.xlu0 %887 }
 0x297   : > { %v966_v19 = vsub.f32 %v644_v9, %v888_v21  ;;  %v814_v9 = vsel %vm782_vm14, 0.903125, %v2662_v14  ;;  %vm793_vm14 = vcmp.eq.s32.totalorder %v2111_v29, %v2324_v25 }
 0x299   : > { %v1062_v11 = vsel %vm1030_vm10, %v966_v19, 0.0  ;;  %vm789_vm10 = vcmp.eq.s32.totalorder %v2111_v29, %v2312_v53 }
 0x29a   : > { %v1094_v6 = vadd.f32 %v1062_v11, %v998_v12  ;;  %v1539_v11 = vld [vmem:[%s1700_s26 + $0x80] sm:$0xff] }
 0x29c   : > { %1126 = vst.msk [vmem:[#allocation2 + $0x40] sm:$0xff] %vm186_vm7, %v1094_v6  ;;  %v846_v6 = vmul.f32 %v1539_v11, %v814_v9 }
 0x29e   : > { %v897_v46 = vpop.xlane.xlu1 %896  ;;  %v910_v55 = vsel %vm283_vm0, %v846_v6, 0.0  ;;  %v821_v6 = vsel %vm789_vm10, 0.903125, %v2662_v14 }
 0x29f   : > { %v969_v0 = vsub.f32 %v647_v42, %v897_v46 }
 0x2a1   : > { %v1065_v47 = vsel %vm1033_vm11, %v969_v0, 0.0  ;;  %vm790_vm11 = vcmp.eq.s32.totalorder %v2111_v29, %v2318_v44 }
 0x2a2   : > { %v1097_v36 = vadd.f32 %v1065_v47, %v1001_v39  ;;  %v1541_v47 = vld [vmem:[%s1700_s26 + $0x78] sm:$0xff] }
 0x2a4   : > { %1129 = vst.msk [vmem:[#allocation2 + $0x58] sm:$0xff] %vm186_vm7, %v1097_v36 }
 0x2a6   : > { %v903_v15 = vpop.xlane.xlu1 %902 }
 0x2a7   : > { %v971_v32 = vsub.f32 %v649_v50, %v903_v15 }
 0x2a9   : > { %v1067_v54 = vsel %vm1035_vm12, %v971_v32, 0.0  ;;  %v699_v38 = vpop.permute.xlu0 %698 }
 0x2aa   : > { %v1099_v2 = vadd.f32 %v1067_v54, %v1003_v5  ;;  %vm775_vm13 = vcmp.eq.s32.totalorder %v2111_v29, %v699_v38  ;;  %v1542_v5 = vld [vmem:[%s1700_s26 + $0x88] sm:$0xff]  ;;  %v738_v54 = vpop.permute.xlu2 %737 }
 0x2ab   : > { %v807_v61 = vsel %vm775_vm13, 0.903125, %v2662_v14  ;;  %v847_v32 = vmul.f32 %v1542_v5, %v815_v23  ;;  %vm788_vm9 = vcmp.eq.s32.totalorder %v2111_v29, %v738_v54  ;;  %v1552_v54 = vld [vmem:[%s1700_s26 + $0xd8] sm:$0xff] }
 0x2ac   : > { %1131 = vst.msk [vmem:[#allocation2 + $0x68] sm:$0xff] %vm186_vm7, %v1099_v2  ;;  %v839_v52 = vmul.f32 %v1538_v51, %v807_v61  ;;  %v817_v61 = vsel %vm785_vm5, 0.903125, %v2662_v14  ;;  %v818_v51 = vsel %vm786_vm6, 0.903125, %v2662_v14  ;;  %vm1034_vm5 = vcmp.ge.s32.totalorder %v2289_v8, 0 }
 0x2ad   : > { %v913_v38 = vsel %vm283_vm0, %v847_v32, 0.0  ;;  %v820_v11 = vsel %vm788_vm9, 0.903125, %v2662_v14  ;;  %vm1037_vm6 = vcmp.ge.s32.totalorder %v2293_v63, 0  ;;  %vm1040_vm9 = vcmp.ge.s32.totalorder %v2297_v40, 0  ;;  %v2672_v40 = vld [vmem:[#allocation7_spill] sm:$0xff] }
 0x2ae   : > { %v906_v30 = vpop.xlane.xlu1 %905  ;;  %v889_v1 = vsel %vm283_vm0, %v839_v52, 0.0 }
 0x2af   : > { %v972_v21 = vsub.f32 %v650_v59, %v906_v30  ;;  %890 = vadd.xlane.f32.xlu2 %v889_v1  ;;  %v1544_v59 = vld [vmem:[%s1700_s26 + $0x98] sm:$0xff]  ;;  %v850_v1 = vmul.f32 %v1545_v43, %v818_v51  ;;  %v1553_v43 = vld [vmem:[%s1700_s26 + $0xe8] sm:$0xff] }
 0x2b0   : > { %v849_v30 = vmul.f32 %v1544_v59, %v817_v61 }
 0x2b1   : > { %v1068_v12 = vsel %vm1036_vm15, %v972_v21, 0.0  ;;  %v708_v19 = vpop.permute.xlu0 %707  ;;  %vm795_vm15 = vcmp.eq.s32.totalorder %v2111_v29, %v2328_v41 }
 0x2b2   : > { %v1100_v7 = vadd.f32 %v1068_v12, %v1004_v35  ;;  %vm778_vm1 = vcmp.eq.s32.totalorder %v2111_v29, %v708_v19  ;;  %v1546_v35 = vld [vmem:[%s1700_s26 + $0xa8] sm:$0xff]  ;;  %v919_v12 = vsel %vm283_vm0, %v849_v30, 0.0  ;;  %v922_v19 = vsel %vm283_vm0, %v850_v1, 0.0  ;;  %v747_v53 = vpop.permute.xlu2 %746 }
 0x2b3   : > { %v810_v45 = vsel %vm778_vm1, 0.903125, %v2662_v14  ;;  %vm791_vm12 = vcmp.eq.s32.totalorder %v2111_v29, %v747_v53  ;;  %v827_v51 = vsel %vm795_vm15, 0.903125, %v2662_v14  ;;  %v1556_v53 = vld [vmem:[%s1700_s26 + $0xf8] sm:$0xff] }
 0x2b4   : > { %1132 = vst.msk [vmem:[#allocation2 + $0x70] sm:$0xff] %vm186_vm7, %v1100_v7  ;;  %v842_v42 = vmul.f32 %v1540_v58, %v810_v45  ;;  %v822_v45 = vsel %vm790_vm11, 0.903125, %v2662_v14  ;;  %v859_v1 = vmul.f32 %v1553_v43, %v827_v51  ;;  %v1191_v51 = vsel %vm186_vm7, %v1155_v24, 0.0 }
 0x2b6   : > { %v898_v46 = vsel %vm283_vm0, %v842_v42, 0.0  ;;  %v1547_v42 = vld [vmem:[%s1700_s26 + $0xb0] sm:$0xff] }
 0x2b7   : > { %911 = vadd.xlane.f32.xlu2 %v910_v55  ;;  %899 = vadd.xlane.f32.xlu0 %v898_v46  ;;  %v852_v44 = vmul.f32 %v1547_v42, %v820_v11  ;;  %v1548_v55 = vld [vmem:[%s1700_s26 + $0xb8] sm:$0xff]  ;;  %v1150_v42 = vld [vmem:[#allocation2] sm:$0xff] }
 0x2b8   : > { %v853_v46 = vmul.f32 %v1548_v55, %v821_v6  ;;  %v1182_v55 = vsel %vm186_vm7, %v1150_v42, 0.0 }
 0x2b9   : > { %v717_v39 = vpop.permute.xlu0 %716  ;;  %v928_v26 = vsel %vm283_vm0, %v852_v44, 0.0  ;;  %v1152_v44 = vld [vmem:[#allocation2 + $0x10] sm:$0xff] }
 0x2ba   : > { %vm781_vm2 = vcmp.eq.s32.totalorder %v2111_v29, %v717_v39  ;;  %v1549_v39 = vld [vmem:[%s1700_s26 + $0xc0] sm:$0xff]  ;;  %v762_v32 = vpop.permute.xlu2 %761 }
 0x2bb   : > { %v813_v0 = vsel %vm781_vm2, 0.903125, %v2662_v14  ;;  %vm796_vm2 = vcmp.eq.s32.totalorder %v2111_v29, %v762_v32 }
 0x2bc   : > { %v845_v36 = vmul.f32 %v1541_v47, %v813_v0  ;;  %v854_v0 = vmul.f32 %v1549_v39, %v822_v45  ;;  %v931_v47 = vsel %vm283_vm0, %v853_v46, 0.0  ;;  %v828_v30 = vsel %vm796_vm2, 0.903125, %v2662_v14  ;;  %v1494_v46 = vpop.eup %1493 }
 0x2bd   : > { %v1185_v39 = vsel %vm186_vm7, %v1152_v44, 0.0  ;;  %v1160_v44 = vld [vmem:[#allocation2 + $0x50] sm:$0xff]  ;;  %vm1048_vm2 = vcmp.ge.s32.totalorder %v2309_v18, 0  ;;  %v2689_v18 = vld [vmem:[#allocation16_spill] sm:$0xff] }
 0x2be   : > { %v907_v50 = vsel %vm283_vm0, %v845_v36, 0.0  ;;  %v823_v36 = vsel %vm791_vm12, 0.903125, %v2662_v14  ;;  %v934_v23 = vsel %vm283_vm0, %v854_v0, 0.0  ;;  %vm1043_vm12 = vcmp.ge.s32.totalorder %v2303_v17, 0 }
 0x2bf   : > { %908 = vadd.xlane.f32.xlu1 %v907_v50 }
 0x2c1   : > { %v726_v15 = vpop.permute.xlu0 %725 }
 0x2c2   : > { %vm784_vm4 = vcmp.eq.s32.totalorder %v2111_v29, %v726_v15  ;;  %v825_v15 = vsel %vm793_vm14, 0.903125, %v2662_v14 }
 0x2c3   : > { %v816_v27 = vsel %vm784_vm4, 0.903125, %v2662_v14  ;;  %vm1038_vm4 = vcmp.ge.s32.totalorder %v2164_v34, 0 }
 0x2c4   : > { %v848_v4 = vmul.f32 %v1543_v56, %v816_v27  ;;  %v1550_v27 = vld [vmem:[%s1700_s26 + $0xc8] sm:$0xff]  ;;  %v1551_v56 = vld [vmem:[%s1700_s26 + $0xd0] sm:$0xff] }
 0x2c5   : > { %v855_v25 = vmul.f32 %v1550_v27, %v823_v36 }
 0x2c6   : > { %v916_v2 = vsel %vm283_vm0, %v848_v4, 0.0 }
 0x2c7   : > { %914 = vadd.xlane.f32.xlu1 %v913_v38  ;;  %917 = vadd.xlane.f32.xlu2 %v916_v2  ;;  %v857_v38 = vmul.f32 %v1552_v54, %v825_v15  ;;  %v937_v2 = vsel %vm283_vm0, %v855_v25, 0.0  ;;  %v1496_v15 = vpop.eup %1495 }
 0x2c8   : > { %v1498_v27 = vpop.eup %1497 }
 0x2c9   : > { %v735_v52 = vpop.permute.xlu0 %734  ;;  %v943_v59 = vsel %vm283_vm0, %v857_v38, 0.0  ;;  %v597_v38 = vmul.f32 0.6931472, %v1496_v15 }
 0x2ca   : > { %vm787_vm8 = vcmp.eq.s32.totalorder %v2111_v29, %v735_v52 }
 0x2cb   : > { %v819_v9 = vsel %vm787_vm8, 0.903125, %v2662_v14 }
 0x2cc   : > { %v851_v21 = vmul.f32 %v1546_v35, %v819_v9  ;;  %v1554_v9 = vld [vmem:[%s1700_s26 + $0xe0] sm:$0xff] }
 0x2ce   : > { %v925_v7 = vsel %vm283_vm0, %v851_v21, 0.0  ;;  %v1555_v21 = vld [vmem:[%s1700_s26 + $0xf0] sm:$0xff]  ;;  %s1582_s26 = scalar_lea.hbm %s2602_s2, 16 }
 0x2cf   : > { %920 = vadd.xlane.f32.xlu1 %v919_v12  ;;  %923 = vadd.xlane.f32.xlu2 %v922_v19  ;;  %v860_v12 = vmul.f32 %v1555_v21, %v828_v30  ;;  %v949_v19 = vsel %vm283_vm0, %v859_v1, 0.0  ;;  %v648_v1 = vadd.f32 %v597_v38, %v1924_v57  ;;  %v1006_v21 = vld [vmem:[#allocation2 + $0x80] sm:$0xff]  ;;  %v2666_v38 = vld [vmem:[#allocation22_spill] sm:$0xff]  ;;  %p1584_p2 = scmp.lt.s32.totalorder %s1582_s26, %s1578_s24 }
 0x2d0   : > { %926 = vadd.xlane.f32.xlu0 %v925_v7  ;;  %1511 = vlog2.f32 %v2666_v38 }
 0x2d1   : > { %v750_v58 = vpop.permute.xlu0 %749  ;;  %v952_v6 = vsel %vm283_vm0, %v860_v12, 0.0  ;;  %p1585_p3 = por %p1584_p2, %p1583_p1 }
 0x2d2   : > { %vm792_vm13 = vcmp.eq.s32.totalorder %v2111_v29, %v750_v58 }
 0x2d3   : > { %v824_v50 = vsel %vm792_vm13, 0.903125, %v2662_v14  ;;  %p1586_p4 = pnand %p1585_p3, %p1581_p0 }
 0x2d4   : > { %v856_v4 = vmul.f32 %v1551_v56, %v824_v50  ;;  %v1154_v50 = vld [vmem:[#allocation2 + $0x20] sm:$0xff] }
 0x2d6   : > { %v940_v61 = vsel %vm283_vm0, %v856_v4, 0.0  ;;  %v1156_v4 = vld [vmem:[#allocation2 + $0x30] sm:$0xff] }
 0x2d7   : > { %929 = vadd.xlane.f32.xlu1 %v928_v26  ;;  %932 = vadd.xlane.f32.xlu2 %v931_v47  ;;  %v591_v26 = vmul.f32 0.6931472, %v1494_v46  ;;  %v1153_v47 = vld [vmem:[#allocation2 + $0x18] sm:$0xff] }
 0x2d8   : > { %935 = vadd.xlane.f32.xlu0 %v934_v23  ;;  %v1187_v10 = vsel %vm186_vm7, %v1153_v47, 0.0  ;;  %v1189_v23 = vsel %vm186_vm7, %v1154_v50, 0.0  ;;  %v1161_v50 = vld [vmem:[#allocation2 + $0x58] sm:$0xff] }
 0x2d9   : > { %v756_v5 = vpop.permute.xlu0 %755  ;;  %v645_v32 = vadd.f32 %v591_v26, %v1909_v22  ;;  %v1201_v26 = vsel %vm186_vm7, %v1160_v44, 0.0  ;;  %v1203_v31 = vsel %vm186_vm7, %v1161_v50, 0.0 }
 0x2da   : > { %vm794_vm1 = vcmp.eq.s32.totalorder %v2111_v29, %v756_v5 }
 0x2db   : > { %v826_v52 = vsel %vm794_vm1, 0.903125, %v2662_v14 }
 0x2dc   : > { %v858_v35 = vmul.f32 %v1554_v9, %v826_v52  ;;  %v1193_v52 = vsel %vm186_vm7, %v1156_v4, 0.0  ;;  %v1500_v9 = vpop.eup %1499  ;;  %v2665_v4 = vld [vmem:[#allocation32_spill] sm:$0xff] }
 0x2dd   : > { %v603_v57 = vmul.f32 0.6931472, %v1500_v9  ;;  %vm1039_vm8 = vcmp.ge.s32.totalorder %v2665_v4, 0 }
 0x2de   : > { %v946_v7 = vsel %vm283_vm0, %v858_v35, 0.0 }
 0x2df   : > { %938 = vadd.xlane.f32.xlu1 %v937_v2  ;;  %941 = vadd.xlane.f32.xlu2 %v940_v61  ;;  %v605_v2 = vmul.f32 0.6931472, %v1498_v27  ;;  %v651_v37 = vadd.f32 %v603_v57, %v1939_v28  ;;  %v2664_v27 = vld [vmem:[#allocation9_spill] sm:$0xff] }
 0x2e0   : > { %944 = vadd.xlane.f32.xlu0 %v943_v59 }
 0x2e1   : > { %v765_v41 = vpop.permute.xlu0 %764  ;;  %v652_v43 = vadd.f32 %v605_v2, %v1935_v13  ;;  %v1007_v2 = vld [vmem:[#allocation2 + $0x88] sm:$0xff] }
 0x2e2   : > { %vm797_vm3 = vcmp.eq.s32.totalorder %v2111_v29, %v765_v41  ;;  %v1151_v29 = vld [vmem:[#allocation2 + $0x8] sm:$0xff]  ;;  %v1158_v41 = vld [vmem:[#allocation2 + $0x40] sm:$0xff] }
 0x2e3   : > { %v829_v11 = vsel %vm797_vm3, 0.903125, %v2662_v14  ;;  %v1183_v14 = vsel %vm186_vm7, %v1151_v29, 0.0  ;;  %v1197_v13 = vsel %vm186_vm7, %v1158_v41, 0.0  ;;  %v1502_v29 = vpop.eup %1501  ;;  %v2667_v41 = vld [vmem:[#allocation23_spill] sm:$0xff] }
 0x2e4   : > { %v861_v45 = vmul.f32 %v1556_v53, %v829_v11  ;;  %v1184_v0 = vadd.f32 %v1183_v14, %v1182_v55  ;;  %v1504_v46 = vpop.eup %1503  ;;  %v607_v47 = vmul.f32 0.6931472, %v1502_v29  ;;  %1513 = vlog2.f32 %v2667_v41  ;;  %v2675_v29 = vld [vmem:[#allocation33_spill] sm:$0xff]  ;;  %v1557_v41 = vld [vmem:[%s2027_s30 + $0xb0] sm:$0xff] }
 0x2e5   : > { %v1506_v15 = vpop.eup %1505  ;;  %vm1042_vm11 = vcmp.ge.s32.totalorder %v2675_v29, 0  ;;  %vm1044_vm13 = vcmp.ge.s32.totalorder %v1557_v41, 0 }
 0x2e6   : > { %v955_v58 = vsel %vm283_vm0, %v861_v45, 0.0  ;;  %v1186_v36 = vadd.f32 %v1185_v39, %v1184_v0  ;;  %vm1031_vm0 = vcmp.ge.s32.totalorder %v2283_v3, 0  ;;  %v1157_v3 = vld [vmem:[#allocation2 + $0x38] sm:$0xff]  ;;  %v1508_v63 = vpop.eup %1507 }
 0x2e7   : > { %950 = vadd.xlane.f32.xlu2 %v949_v19  ;;  %947 = vadd.xlane.f32.xlu1 %v946_v7  ;;  %v1002_v19 = vld [vmem:[#allocation2 + $0x60] sm:$0xff]  ;;  %v1195_v11 = vsel %vm186_vm7, %v1157_v3, 0.0  ;;  %v1005_v39 = vld [vmem:[#allocation2 + $0x78] sm:$0xff]  ;;  %v613_v3 = vmul.f32 0.6931472, %v1506_v15 }
 0x2e8   : > { %953 = vadd.xlane.f32.xlu0 %v952_v6  ;;  %v1188_v5 = vadd.f32 %v1187_v10, %v1186_v36  ;;  %v609_v36 = vmul.f32 0.6931472, %v1504_v46 }
 0x2ea   : > { %v1190_v56 = vadd.f32 %v1189_v23, %v1188_v5 }
 0x2ec   : > { %v1192_v22 = vadd.f32 %v1191_v51, %v1190_v56  ;;  %v1510_v56 = vpop.eup %1509  ;;  %v1008_v51 = vld [vmem:[#allocation2 + $0x90] sm:$0xff] }
 0x2ed   : > { %v1512_v57 = vpop.eup %1511 }
 0x2ee   : > { %v1194_v30 = vadd.f32 %v1193_v52, %v1192_v22 }
 0x2ef   : > { %956 = vadd.xlane.f32.xlu1 %v955_v58 }
 0x2f0   : > { %v1196_v6 = vadd.f32 %v1195_v11, %v1194_v30  ;;  %v615_v30 = vmul.f32 0.6931472, %v1508_v63 }
 0x2f2   : > { %v1198_v58 = vadd.f32 %v1197_v13, %v1196_v6  ;;  %v2669_v13 = vld [vmem:[#allocation25_spill] sm:$0xff]  ;;  %v2670_v6 = vld [vmem:[#allocation24_spill] sm:$0xff] }
 0x322   : > { %v891_v25 = vpop.xlane.xlu2 %890 }
 0x323   : > { %v967_v54 = vsub.f32 %v645_v32, %v891_v25  ;;  %v653_v32 = vadd.f32 %v607_v47, %v2663_v33  ;;  %v654_v25 = vadd.f32 %v609_v36, %v2664_v27 }
 0x325   : > { %v1063_v61 = vsel %vm1031_vm0, %v967_v54, 0.0 }
 0x326   : > { %v1095_v59 = vadd.f32 %v1063_v61, %v999_v49 }
 0x328   : > { %1127 = vst.msk [vmem:[#allocation2 + $0x48] sm:$0xff] %vm186_vm7, %v1095_v59  ;;  %v1163_v59 = vld [vmem:[#allocation2 + $0x68] sm:$0xff] }
 0x32a   : > { %v912_v48 = vpop.xlane.xlu2 %911  ;;  %v900_v35 = vpop.xlane.xlu0 %899 }
 0x32b   : > { %v974_v12 = vsub.f32 %v652_v43, %v912_v48  ;;  %v970_v7 = vsub.f32 %v648_v1, %v900_v35  ;;  %v611_v43 = vmul.f32 0.6931472, %v1510_v56  ;;  %v2668_v1 = vld [vmem:[#allocation21_spill] sm:$0xff] }
 0x32c   : > { %1515 = vlog2.f32 %v2668_v1 }
 0x32d   : > { %v1070_v53 = vsel %vm1038_vm4, %v974_v12, 0.0  ;;  %v1066_v34 = vsel %vm1034_vm5, %v970_v7, 0.0  ;;  %v1207_v12 = vsel %vm186_vm7, %v1163_v59, 0.0  ;;  %1517 = vlog2.f32 %v2669_v13  ;;  %v2679_v59 = vld [vmem:[#allocation10_spill] sm:$0xff] }
 0x32e   : > { %v1102_v45 = vadd.f32 %v1070_v53, %v1006_v21  ;;  %v1098_v8 = vadd.f32 %v1066_v34, %v1002_v19  ;;  %v1164_v19 = vld [vmem:[#allocation2 + $0x70] sm:$0xff]  ;;  %1519 = vlog2.f32 %v2670_v6  ;;  %v2671_v53 = vld [vmem:[#allocation8_spill] sm:$0xff]  ;;  %vm1050_vm4 = vcmp.ge.s32.totalorder %v2315_v16, 0 }
 0x32f   : > { %v1159_v42 = vld [vmem:[#allocation2 + $0x48] sm:$0xff]  ;;  %v655_v34 = vadd.f32 %v611_v43, %v2671_v53  ;;  %v2681_v43 = vld [vmem:[#allocation34_spill] sm:$0xff] }
 0x330   : > { %v1199_v60 = vsel %vm186_vm7, %v1159_v42, 0.0  ;;  %1134 = vst.msk [vmem:[#allocation2 + $0x80] sm:$0xff] %vm186_vm7, %v1102_v45  ;;  %v656_v45 = vadd.f32 %v613_v3, %v2672_v40  ;;  %v1514_v42 = vpop.eup %1513  ;;  %vm1045_vm14 = vcmp.ge.s32.totalorder %v2681_v43, 0  ;;  %v1014_v40 = vld [vmem:[#allocation2 + $0xc0] sm:$0xff] }
 0x331   : > { %v1200_v55 = vadd.f32 %v1199_v60, %v1198_v58  ;;  %1130 = vst.msk [vmem:[#allocation2 + $0x60] sm:$0xff] %vm186_vm7, %v1098_v8  ;;  %v2673_v8 = vld [vmem:[#allocation12_spill] sm:$0xff]  ;;  %v2674_v60 = vld [vmem:[#allocation31_spill] sm:$0xff] }
 0x332   : > { %v909_v14 = vpop.xlane.xlu1 %908  ;;  %v657_v58 = vadd.f32 %v615_v30, %v2673_v8  ;;  %vm1041_vm10 = vcmp.ge.s32.totalorder %v2674_v60, 0  ;;  %v2680_v30 = vld [vmem:[#allocation27_spill] sm:$0xff] }
 0x333   : > { %v973_v0 = vsub.f32 %v651_v37, %v909_v14  ;;  %v1202_v23 = vadd.f32 %v1201_v26, %v1200_v55  ;;  %v1209_v37 = vsel %vm186_vm7, %v1164_v19, 0.0  ;;  %v1516_v14 = vpop.eup %1515  ;;  %v1010_v26 = vld [vmem:[#allocation2 + $0xa0] sm:$0xff] }
 0x334   : > { %v1518_v27 = vpop.eup %1517 }
 0x335   : > { %v1069_v10 = vsel %vm1037_vm6, %v973_v0, 0.0  ;;  %v1204_v62 = vadd.f32 %v1203_v31, %v1202_v23  ;;  %v2676_v23 = vld [vmem:[#allocation26_spill] sm:$0xff]  ;;  %v617_v31 = vmul.f32 0.6931472, %v1514_v42  ;;  %v1520_v4 = vpop.eup %1519  ;;  %v625_v53 = vmul.f32 0.6931472, %v1518_v27 }
 0x336   : > { %v1101_v28 = vadd.f32 %v1069_v10, %v1005_v39  ;;  %v1009_v39 = vld [vmem:[#allocation2 + $0x98] sm:$0xff]  ;;  %v619_v10 = vmul.f32 0.6931472, %v1512_v57  ;;  %1521 = vlog2.f32 %v2676_v23  ;;  %v627_v8 = vmul.f32 0.6931472, %v1520_v4  ;;  %v2686_v23 = vld [vmem:[#allocation13_spill] sm:$0xff] }
 0x337   : > { %v1166_v33 = vld [vmem:[#allocation2 + $0x80] sm:$0xff]  ;;  %v1016_v4 = vld [vmem:[#allocation2 + $0xd0] sm:$0xff]  ;;  %vm1053_vm6 = vcmp.ge.s32.totalorder %v2321_v20, 0 }
 0x338   : > { %v1162_v5 = vld [vmem:[#allocation2 + $0x60] sm:$0xff]  ;;  %1133 = vst.msk [vmem:[#allocation2 + $0x78] sm:$0xff] %vm186_vm7, %v1101_v28  ;;  %v1011_v28 = vld [vmem:[#allocation2 + $0xa8] sm:$0xff]  ;;  %v1213_v38 = vsel %vm186_vm7, %v1166_v33, 0.0 }
 0x339   : > { %v1205_v24 = vsel %vm186_vm7, %v1162_v5, 0.0 }
 0x33a   : > { %v915_v49 = vpop.xlane.xlu1 %914  ;;  %v918_v54 = vpop.xlane.xlu2 %917  ;;  %v1206_v22 = vadd.f32 %v1205_v24, %v1204_v62 }
 0x33b   : > { %v975_v61 = vsub.f32 %v653_v32, %v915_v49  ;;  %v976_v52 = vsub.f32 %v654_v25, %v918_v54  ;;  %v621_v25 = vmul.f32 0.6931472, %v1516_v14 }
 0x33c   : > { %v1208_v11 = vadd.f32 %v1207_v12, %v1206_v22  ;;  %v659_v22 = vadd.f32 %v619_v10, %v2679_v59  ;;  %v1522_v17 = vpop.eup %1521  ;;  %v1012_v12 = vld [vmem:[#allocation2 + $0xb0] sm:$0xff] }
 0x33d   : > { %v1071_v9 = vsel %vm1039_vm8, %v975_v61, 0.0  ;;  %v1072_v48 = vsel %vm1040_vm9, %v976_v52, 0.0  ;;  %v2677_v61 = vld [vmem:[#allocation28_spill] sm:$0xff] }
 0x33e   : > { %v1103_v35 = vadd.f32 %v1071_v9, %v1007_v2  ;;  %v1104_v21 = vadd.f32 %v1072_v48, %v1008_v51  ;;  %v1210_v50 = vadd.f32 %v1209_v37, %v1208_v11  ;;  %1523 = vlog2.f32 %v2677_v61  ;;  %v2678_v51 = vld [vmem:[#allocation11_spill] sm:$0xff] }
 0x33f   : > { %v1165_v7 = vld [vmem:[#allocation2 + $0x78] sm:$0xff]  ;;  %v658_v52 = vadd.f32 %v617_v31, %v2678_v51  ;;  %1525 = vlog2.f32 %v2680_v30  ;;  %v2688_v51 = vld [vmem:[#allocation30_spill] sm:$0xff] }
 0x340   : > { %1135 = vst.msk [vmem:[#allocation2 + $0x88] sm:$0xff] %vm186_vm7, %v1103_v35  ;;  %v1211_v46 = vsel %vm186_vm7, %v1165_v7, 0.0  ;;  %v2682_v48 = vld [vmem:[#allocation15_spill] sm:$0xff] }
 0x341   : > { %1136 = vst.msk [vmem:[#allocation2 + $0x90] sm:$0xff] %vm186_vm7, %v1104_v21  ;;  %v1212_v32 = vadd.f32 %v1211_v46, %v1210_v50  ;;  %v660_v35 = vadd.f32 %v621_v25, %v2682_v48  ;;  %v2683_v21 = vld [vmem:[#allocation35_spill] sm:$0xff]  ;;  %v2685_v50 = vld [vmem:[#allocation14_spill] sm:$0xff] }
 0x342   : > { %v921_v44 = vpop.xlane.xlu1 %920  ;;  %v924_v55 = vpop.xlane.xlu2 %923  ;;  %vm1046_vm15 = vcmp.ge.s32.totalorder %v2683_v21, 0  ;;  %v1013_v7 = vld [vmem:[#allocation2 + $0xb8] sm:$0xff] }
 0x343   : > { %v977_v0 = vsub.f32 %v655_v34, %v921_v44  ;;  %v978_v47 = vsub.f32 %v656_v45, %v924_v55  ;;  %v927_v36 = vpop.xlane.xlu0 %926  ;;  %v1214_v3 = vadd.f32 %v1213_v38, %v1212_v32  ;;  %v2684_v34 = vld [vmem:[#allocation29_spill] sm:$0xff]  ;;  %v2687_v32 = vld [vmem:[#allocation18_spill] sm:$0xff] }
 0x344   : > { %v979_v15 = vsub.f32 %v657_v58, %v927_v36  ;;  %1527 = vlog2.f32 %v2684_v34  ;;  %v623_v58 = vmul.f32 0.6931472, %v1522_v17  ;;  %v1524_v46 = vpop.eup %1523  ;;  %v663_v27 = vadd.f32 %v627_v8, %v2687_v32  ;;  %v2692_v32 = vld [vmem:[#allocation19_spill] sm:$0xff] }
 0x345   : > { %v1073_v5 = vsel %vm1041_vm10, %v977_v0, 0.0  ;;  %v1074_v63 = vsel %vm1042_vm11, %v978_v47, 0.0  ;;  %v631_v61 = vmul.f32 0.6931472, %v1524_v46  ;;  %1529 = vlog2.f32 %v2688_v51 }
 0x346   : > { %v1105_v62 = vadd.f32 %v1073_v5, %v1009_v39  ;;  %v1106_v24 = vadd.f32 %v1074_v63, %v1010_v26  ;;  %v1075_v56 = vsel %vm1043_vm12, %v979_v15, 0.0  ;;  %v1526_v26 = vpop.eup %1525  ;;  %v661_v10 = vadd.f32 %v623_v58, %v2685_v50  ;;  %v1558_v5 = vld [vmem:[%s2027_s30 + $0xc8] sm:$0xff] }
 0x347   : > { %v1107_v49 = vadd.f32 %v1075_v56, %v1011_v28  ;;  %v1167_v54 = vld [vmem:[#allocation2 + $0x88] sm:$0xff]  ;;  %v662_v28 = vadd.f32 %v625_v53, %v2686_v23  ;;  %vm1047_vm1 = vcmp.ge.s32.totalorder %v1558_v5, 0 }
 0x348   : > { %1137 = vst.msk [vmem:[#allocation2 + $0x98] sm:$0xff] %vm186_vm7, %v1105_v62  ;;  %v1215_v2 = vsel %vm186_vm7, %v1167_v54, 0.0  ;;  %v1168_v57 = vld [vmem:[#allocation2 + $0x90] sm:$0xff]  ;;  %v1559_v62 = vld [vmem:[%s2027_s30 + $0xd8] sm:$0xff]  ;;  %v1560_v53 = vld [vmem:[%s2027_s30 + $0xe8] sm:$0xff] }
 0x349   : > { %1138 = vst.msk [vmem:[#allocation2 + $0xa0] sm:$0xff] %vm186_vm7, %v1106_v24  ;;  %v1216_v6 = vadd.f32 %v1215_v2, %v1214_v3  ;;  %v1217_v37 = vsel %vm186_vm7, %v1168_v57, 0.0  ;;  %vm1049_vm3 = vcmp.ge.s32.totalorder %v1559_v62, 0  ;;  %v1015_v24 = vld [vmem:[#allocation2 + $0xc8] sm:$0xff]  ;;  %vm1051_vm0 = vcmp.ge.s32.totalorder %v1560_v53, 0  ;;  %v1021_v62 = vld [vmem:[#allocation2 + $0xf8] sm:$0xff] }
 0x34a   : > { %1139 = vst.msk [vmem:[#allocation2 + $0xa8] sm:$0xff] %vm186_vm7, %v1107_v49  ;;  %v930_v1 = vpop.xlane.xlu1 %929  ;;  %v933_v9 = vpop.xlane.xlu2 %932 }
 0x34b   : > { %v980_v19 = vsub.f32 %v658_v52, %v930_v1  ;;  %v981_v11 = vsub.f32 %v659_v22, %v933_v9  ;;  %v936_v13 = vpop.xlane.xlu0 %935  ;;  %v1218_v0 = vadd.f32 %v1217_v37, %v1216_v6  ;;  %v1528_v31 = vpop.eup %1527  ;;  %v1017_v52 = vld [vmem:[#allocation2 + $0xd8] sm:$0xff]  ;;  %v633_v22 = vmul.f32 0.6931472, %v1526_v26 }
 0x34c   : > { %v982_v45 = vsub.f32 %v660_v35, %v936_v13  ;;  %v629_v3 = vmul.f32 0.6931472, %v1528_v31  ;;  %v1530_v6 = vpop.eup %1529 }
 0x34d   : > { %v1076_v42 = vsel %vm1044_vm13, %v980_v19, 0.0  ;;  %v1077_v60 = vsel %vm1045_vm14, %v981_v11, 0.0  ;;  %v2690_v11 = vld [vmem:[#allocation17_spill] sm:$0xff]  ;;  %v635_v26 = vmul.f32 0.6931472, %v1530_v6 }
 0x34e   : > { %v1108_v29 = vadd.f32 %v1076_v42, %v1012_v12  ;;  %v1109_v44 = vadd.f32 %v1077_v60, %v1013_v7  ;;  %v1078_v55 = vsel %vm1046_vm15, %v982_v45, 0.0  ;;  %v665_v7 = vadd.f32 %v631_v61, %v2689_v18  ;;  %v2691_v45 = vld [vmem:[#allocation20_spill] sm:$0xff]  ;;  %v1561_v42 = vld [vmem:[%s2027_s30 + $0xf0] sm:$0xff]  ;;  %v1019_v60 = vld [vmem:[#allocation2 + $0xe8] sm:$0xff] }
 0x34f   : > { %v1110_v14 = vadd.f32 %v1078_v55, %v1014_v40  ;;  %v1169_v39 = vld [vmem:[#allocation2 + $0x98] sm:$0xff]  ;;  %v664_v13 = vadd.f32 %v629_v3, %v2690_v11  ;;  %v666_v8 = vadd.f32 %v633_v22, %v2691_v45  ;;  %vm1052_vm5 = vcmp.ge.s32.totalorder %v1561_v42, 0 }
 0x350   : > { %1140 = vst.msk [vmem:[#allocation2 + $0xb0] sm:$0xff] %vm186_vm7, %v1108_v29  ;;  %v1170_v47 = vld [vmem:[#allocation2 + $0xa0] sm:$0xff]  ;;  %v1219_v36 = vsel %vm186_vm7, %v1169_v39, 0.0  ;;  %v1020_v39 = vld [vmem:[#allocation2 + $0xf0] sm:$0xff] }
 0x351   : > { %1141 = vst.msk [vmem:[#allocation2 + $0xb8] sm:$0xff] %vm186_vm7, %v1109_v44  ;;  %v1220_v15 = vadd.f32 %v1219_v36, %v1218_v0  ;;  %v1221_v25 = vsel %vm186_vm7, %v1170_v47, 0.0  ;;  %v1171_v38 = vld [vmem:[#allocation2 + $0xa8] sm:$0xff]  ;;  %v1018_v44 = vld [vmem:[#allocation2 + $0xe0] sm:$0xff] }
 0x352   : > { %1142 = vst.msk [vmem:[#allocation2 + $0xc0] sm:$0xff] %vm186_vm7, %v1110_v14  ;;  %v939_v63 = vpop.xlane.xlu1 %938  ;;  %v942_v33 = vpop.xlane.xlu2 %941  ;;  %v1223_v9 = vsel %vm186_vm7, %v1171_v38, 0.0 }
 0x353   : > { %v983_v56 = vsub.f32 %v661_v10, %v939_v63  ;;  %v984_v49 = vsub.f32 %v662_v28, %v942_v33  ;;  %v945_v54 = vpop.xlane.xlu0 %944  ;;  %v1222_v2 = vadd.f32 %v1221_v25, %v1220_v15 }
 0x354   : > { %v985_v59 = vsub.f32 %v663_v27, %v945_v54  ;;  %v667_v27 = vadd.f32 %v635_v26, %v2692_v32 }
 0x355   : > { %v1079_v17 = vsel %vm1047_vm1, %v983_v56, 0.0  ;;  %v1080_v30 = vsel %vm1048_vm2, %v984_v49, 0.0  ;;  %v1224_v21 = vadd.f32 %v1223_v9, %v1222_v2 }
 0x356   : > { %v1111_v41 = vadd.f32 %v1079_v17, %v1015_v24  ;;  %v1112_v43 = vadd.f32 %v1080_v30, %v1016_v4  ;;  %v1081_v1 = vsel %vm1049_vm3, %v985_v59, 0.0 }
 0x357   : > { %v1113_v48 = vadd.f32 %v1081_v1, %v1017_v52  ;;  %v1172_v35 = vld [vmem:[#allocation2 + $0xb0] sm:$0xff] }
 0x358   : > { %1143 = vst.msk [vmem:[#allocation2 + $0xc8] sm:$0xff] %vm186_vm7, %v1111_v41  ;;  %v1173_v12 = vld [vmem:[#allocation2 + $0xb8] sm:$0xff]  ;;  %v1225_v19 = vsel %vm186_vm7, %v1172_v35, 0.0 }
 0x359   : > { %1144 = vst.msk [vmem:[#allocation2 + $0xd0] sm:$0xff] %vm186_vm7, %v1112_v43  ;;  %v1226_v57 = vadd.f32 %v1225_v19, %v1224_v21  ;;  %v1227_v58 = vsel %vm186_vm7, %v1173_v12, 0.0  ;;  %v1174_v46 = vld [vmem:[#allocation2 + $0xc0] sm:$0xff] }
 0x35a   : > { %1145 = vst.msk [vmem:[#allocation2 + $0xd8] sm:$0xff] %vm186_vm7, %v1113_v48  ;;  %v951_v34 = vpop.xlane.xlu2 %950  ;;  %v948_v40 = vpop.xlane.xlu1 %947  ;;  %v1229_v28 = vsel %vm186_vm7, %v1174_v46, 0.0 }
 0x35b   : > { %v987_v29 = vsub.f32 %v665_v7, %v951_v34  ;;  %v986_v55 = vsub.f32 %v664_v13, %v948_v40  ;;  %v954_v37 = vpop.xlane.xlu0 %953  ;;  %v1228_v14 = vadd.f32 %v1227_v58, %v1226_v57 }
 0x35c   : > { %v988_v0 = vsub.f32 %v666_v8, %v954_v37 }
 0x35d   : > { %v1083_v47 = vsel %vm1051_vm0, %v987_v29, 0.0  ;;  %v1082_v36 = vsel %vm1050_vm4, %v986_v55, 0.0  ;;  %v1230_v5 = vadd.f32 %v1229_v28, %v1228_v14 }
 0x35e   : > { %v1115_v50 = vadd.f32 %v1083_v47, %v1019_v60  ;;  %v1114_v10 = vadd.f32 %v1082_v36, %v1018_v44  ;;  %v1084_v23 = vsel %vm1052_vm5, %v988_v0, 0.0 }
 0x35f   : > { %v1116_v15 = vadd.f32 %v1084_v23, %v1020_v39  ;;  %v1175_v31 = vld [vmem:[#allocation2 + $0xc8] sm:$0xff] }
 0x360   : > { %1147 = vst.msk [vmem:[#allocation2 + $0xe8] sm:$0xff] %vm186_vm7, %v1115_v50  ;;  %v1176_v63 = vld [vmem:[#allocation2 + $0xd0] sm:$0xff]  ;;  %v1231_v33 = vsel %vm186_vm7, %v1175_v31, 0.0 }
 0x361   : > { %1146 = vst.msk [vmem:[#allocation2 + $0xe0] sm:$0xff] %vm186_vm7, %v1114_v10  ;;  %v1232_v25 = vadd.f32 %v1231_v33, %v1230_v5  ;;  %v1233_v56 = vsel %vm186_vm7, %v1176_v63, 0.0  ;;  %v1177_v4 = vld [vmem:[#allocation2 + $0xd8] sm:$0xff] }
 0x362   : > { %1148 = vst.msk [vmem:[#allocation2 + $0xf0] sm:$0xff] %vm186_vm7, %v1116_v15  ;;  %v957_v16 = vpop.xlane.xlu1 %956  ;;  %v1235_v2 = vsel %vm186_vm7, %v1177_v4, 0.0 }
 0x363   : > { %v989_v24 = vsub.f32 %v667_v27, %v957_v16  ;;  %v1234_v49 = vadd.f32 %v1233_v56, %v1232_v25 }
 0x365   : > { %v1085_v54 = vsel %vm1053_vm6, %v989_v24, 0.0  ;;  %v1236_v52 = vadd.f32 %v1235_v2, %v1234_v49 }
 0x366   : > { %v1117_v38 = vadd.f32 %v1085_v54, %v1021_v62 }
 0x367   : > { %v1179_v51 = vld [vmem:[#allocation2 + $0xe8] sm:$0xff] }
 0x368   : > { %1149 = vst.msk [vmem:[#allocation2 + $0xf8] sm:$0xff] %vm186_vm7, %v1117_v38  ;;  %v1178_v61 = vld [vmem:[#allocation2 + $0xe0] sm:$0xff]  ;;  %v1239_v3 = vsel %vm186_vm7, %v1179_v51, 0.0 }
 0x369   : > { %v1237_v20 = vsel %vm186_vm7, %v1178_v61, 0.0  ;;  %v1180_v22 = vld [vmem:[#allocation2 + $0xf0] sm:$0xff] }
 0x36a   : > { %v1238_v59 = vadd.f32 %v1237_v20, %v1236_v52  ;;  %v1241_v30 = vsel %vm186_vm7, %v1180_v22, 0.0 }
 0x36c   : > { %v1240_v17 = vadd.f32 %v1239_v3, %v1238_v59 }
 0x36e   : > { %v1242_v43 = vadd.f32 %v1241_v30, %v1240_v17 }
 0x36f   : > { %v1181_v41 = vld [vmem:[#allocation2 + $0xf8] sm:$0xff] }
 0x370   : > { %v1243_v1 = vsel %vm186_vm7, %v1181_v41, 0.0 }
 0x371   : > { %v1244_v9 = vadd.f32 %v1243_v1, %v1242_v43 }
 0x373   : > { %1245 = vadd.xlane.f32.xlu2 %v1244_v9 }
 0x3e6   : > { %v1246_v48 = vpop.xlane.xlu2 %1245 }
 0x3e7   : > { %v1247_v35 = vrot.slane %v1246_v48, 4 }
 0x3e9   : > { %v1248_v21 = vadd.f32 %v1247_v35, %v1246_v48 }
 0x3eb   : > { %v1249_v12 = vrot.slane %v1248_v21, 2 }
 0x3ed   : > { %v1250_v19 = vadd.f32 %v1249_v12, %v1248_v21 }
 0x3ef   : > { %v1251_v18 = vrot.slane %v1250_v19, 1 }
 0x3f1   : > { %v1252_v7 = vadd.f32 %v1251_v18, %v1250_v19 }
 0x3f3   : > { %1356 = vpush %v1252_v7 }
 0x424   : > { %s1357_s21 = spop %1356 }
 0x425   : > { %v1254_v11 = vstv %s1357_s21 }
 0x426   : > { %1255 = vst [vmem:[%s165_s14] sm:$0xff] %v1254_v11 }
 0x427   : > { %1589 = shalt.err (!%p1586_p4)
}
 0x428   : > { %1358 = dma.vmem_to_hbm [thread:$0]  (%p1682_p5), %s1270_s16, 128, %s1272_s17, %s1257_s22  }
 0x429 PF: > { %p1364_p7 = scmp.ge.s32.totalorder %s1624_s12, 2  ;;  %s1283_s29 = sand.u32 1, %s1612_s9  }
 0x42a   : > { %s1284_s30 = scalar_lea.sflag [#allocation4], %s1283_s29 }
 0x42b   : > { %p1361_p8 = pnand %p1364_p7, %p1686_p6 }
 0x42d   : > { %p1362_p9 = pneg %p1361_p8 }
 0x42f   : > { %1607 = dma.done.wait (%p1362_p9), %s1284_s30, 128  }
 0x430   : > { %1609 = vsyncadd (%p1362_p9), %s1284_s30, 4294967168  ;;  %p12_p10 = scmp.ge.s32.totalorder %s1669_s15, 4   ;;  %s2693_s9 = smov %s1616_s10 }
 0x431   : > { %s2694_s10 = smov %s1620_s11  ;;  %s2695_s11 = smov %s1680_s18 }
 0x432   : > { %s2696_s12 = smov %s1669_s15  ;;  %14 = sbr.rel (!%p12_p10) target bundleno = 3 (0x3), region = 66 }
 0x437   :  { %1290 = vsyncpa [#allocation4], 1 }
 0x438   :  { %1292 = vsyncpa [#allocation4 + $0x1], 1 }

</bundles_post_ra>
